<compile_context>
chip_gen: v7x
topology: tpu7x:2x2x1
jax: 0.10.0
libtpu: 0.0.40
codegen_flags: <defaults>
</compile_context>

<pallas_src>
import functools

import jax
import jax.numpy as jnp
from jax.experimental import pallas as pl
from jax.experimental.pallas import tpu as pltpu

HIDDEN = 32          # args.hidden
VOCAB = 4            # args.vocab_size (A/U/C/G)
K_NEIGHBORS = 3      # args.k_neighbors
NUM_ENC = 2          # args.num_encoder_layers
NUM_DEC = 2          # args.num_decoder_layers
RBF_DIM = 16
EPS = 1e-5           # PyTorch LayerNorm default
LANE = 128
H3 = K_NEIGHBORS * HIDDEN   # 96


def _ln(x, g, b):
    mu = jnp.mean(x, axis=-1, keepdims=True)
    var = jnp.mean((x - mu) ** 2, axis=-1, keepdims=True)
    return (x - mu) * jax.lax.rsqrt(var + EPS) * g + b


def _round_up(x, m):
    return ((x + m - 1) // m) * m


def _pick_tile(n, target=2048):
    """Row tile: multiple of 16 (bf16 sublane tile), <= target, >= 2 grid steps
    when possible (v7x has 2 TensorCores)."""
    n16 = _round_up(max(n, 16), 16)
    if n16 <= 16:
        return 16, 16
    half = max(16, (n16 // 2) // 16 * 16)
    tile = min(target, half)
    return tile, _round_up(n16, tile)


def _block_diag_k(w, k):
    h_in, h_out = w.shape
    out = jnp.zeros((k * h_in, k * h_out), w.dtype)
    for i in range(k):
        out = out.at[i * h_in:(i + 1) * h_in, i * h_out:(i + 1) * h_out].set(w)
    return out


# ----------------------------- Pallas kernel -----------------------------

def _fused_layer_kernel(hv_ref, he_ref, hs_ref, wn_ref, ww_ref, wf_ref, vv_ref,
                        *out_refs, with_readout):
    """One full MPNN layer (+ optional readout) for a tile of nodes.

    message MLP : W3(relu(W2(relu(W1([h_E, h_V[dst], h_V[src]]))))) — packed so
                  the K=3 edges of a node live in 96 lanes (block-diag weights).
    dh          : exact scatter-mean over the K node-contiguous edges, folded
                  into the stacked/averaged W3.
    node update : h = LN(h_V + dh); h_res = LN(h + FFN(h))
    skip        : h_V_new = h_V + LN(relu(Linear(h_res)))
    readout     : logits = h_V_new @ W_read + b_read  (last layer only)
    """
    H = HIDDEN
    f32 = jnp.float32

    hv = hv_ref[...]                                   # (tile, H) f32
    hv_b = hv.astype(jnp.bfloat16)

    # --- weight slabs (bf16); row offsets are multiples of 16 ---
    w1d3 = ww_ref[0:H, :]                              # (H, 3H)   W1[dst] tiled over K
    w1e = ww_ref[H:H + H3, :]                          # (3H, 3H)  block-diag(W1[edge])
    w1s = ww_ref[H + H3:H + 2 * H3, :]                 # (3H, 3H)  block-diag(W1[src])
    w2b = ww_ref[H + 2 * H3:H + 3 * H3, :]             # (3H, 3H)  block-diag(W2)
    w3s = wn_ref[0:H3, :]                              # (3H, H)   [W3;W3;W3]/K
    sw = wn_ref[H3:H3 + H, :]                          # (H, H)    skip linear
    wd2 = wn_ref[H3 + H:H3 + 5 * H, :]                 # (4H, H)   FFN second
    wd1 = wf_ref[0:H, :]                               # (H, 4H=128) FFN first

    # --- bias / LayerNorm vectors (f32), sliced from one (16,128) slab ---
    vv = vv_ref[...]
    b1 = vv[0:1, :H3]
    b2 = vv[1:2, :H3]
    b3 = vv[2:3, :H]
    g1, bb1 = vv[3:4, :H], vv[4:5, :H]
    bd1 = vv[5:6, :]
    bd2 = vv[6:7, :H]
    g2, bb2 = vv[7:8, :H], vv[8:9, :H]
    sb = vv[9:10, :H]
    sg, sbeta = vv[10:11, :H], vv[11:12, :H]

    # --- message MLP (96-lane dense); exact scatter-mean folded into w3s ---
    pre = (jnp.dot(he_ref[...], w1e, preferred_element_type=f32)
           + jnp.dot(hs_ref[...], w1s, preferred_element_type=f32)
           + jnp.dot(hv_b, w1d3, preferred_element_type=f32)
           + b1)
    h1 = jnp.maximum(pre, 0.0)
    h2 = jnp.maximum(jnp.dot(h1.astype(jnp.bfloat16), w2b,
                             preferred_element_type=f32) + b2, 0.0)
    dh = jnp.dot(h2.astype(jnp.bfloat16), w3s, preferred_element_type=f32) + b3

    # --- node update (dropout = identity in eval) ---
    h = _ln(hv + dh, g1, bb1)
    f = jnp.maximum(jnp.dot(h.astype(jnp.bfloat16), wd1,
                            preferred_element_type=f32) + bd1, 0.0)
    f = jnp.dot(f.astype(jnp.bfloat16), wd2, preferred_element_type=f32) + bd2
    h_res = _ln(h + f, g2, bb2)

    # --- skip: h_V + LayerNorm(ReLU(Linear(h_res))) ---
    s = jnp.maximum(jnp.dot(h_res.astype(jnp.bfloat16), sw,
                            preferred_element_type=f32) + sb, 0.0)
    hv_new = hv + _ln(s, sg, sbeta)
    out_refs[0][...] = hv_new.astype(out_refs[0].dtype)

    if with_readout:
        rw = wf_ref[H:2 * H, :]                        # (H, 128) zero-padded readout W
        rb = vv[12:13, :]
        out_refs[1][...] = (jnp.dot(hv_new.astype(jnp.bfloat16), rw,
                                    preferred_element_type=f32) + rb
                            ).astype(out_refs[1].dtype)


def fused_layer(h_V_pad, hE_slab, hS_slab, wn, ww, wf, vv, tile, with_readout=False):
    N_pad, H = h_V_pad.shape
    full = lambda i: (0, 0)
    row = lambda i: (i, 0)

    in_specs = [
        pl.BlockSpec((tile, H), row),      # h_V tile (f32)
        pl.BlockSpec((tile, H3), row),     # h_E slab (bf16)
        pl.BlockSpec((tile, H3), row),     # h_V[src] slab (bf16)
        pl.BlockSpec(wn.shape, full),      # narrow-lane weight slab
        pl.BlockSpec(ww.shape, full),      # 96-lane weight slab
        pl.BlockSpec(wf.shape, full),      # 128-lane weight slab
        pl.BlockSpec(vv.shape, full),      # bias / LN vector slab
    ]
    if with_readout:
        out_shape = (jax.ShapeDtypeStruct((N_pad, H), jnp.float32),
                     jax.ShapeDtypeStruct((N_pad, LANE), jnp.float32))
        out_specs = (pl.BlockSpec((tile, H), row),
                     pl.BlockSpec((tile, LANE), row))
    else:
        out_shape = jax.ShapeDtypeStruct((N_pad, H), jnp.float32)
        out_specs = pl.BlockSpec((tile, H), row)

    return pl.pallas_call(
        functools.partial(_fused_layer_kernel, with_readout=with_readout),
        out_shape=out_shape,
        grid_spec=pltpu.PrefetchScalarGridSpec(
            num_scalar_prefetch=0, grid=(N_pad // tile,),
            in_specs=in_specs, out_specs=out_specs),
        compiler_params=pltpu.CompilerParams(
            dimension_semantics=("parallel",),
            vmem_limit_bytes=48 * 1024 * 1024),
    )(h_V_pad, hE_slab, hS_slab, wn, ww, wf, vv)


# ----------------------------- weight packing -----------------------------

def _pad_vec(v, width=LANE):
    v = v.reshape(1, -1)
    return jnp.pad(v, ((0, 0), (0, width - v.shape[1])))


def pack_layer_weights(lp, sp, read_w=None, read_b=None):
    H, K = HIDDEN, K_NEIGHBORS
    w1 = lp["w1"]
    w1e, w1d, w1s = w1[:H], w1[H:2 * H], w1[2 * H:]           # concat order of the ref model

    ww = jnp.concatenate(
        [jnp.concatenate([w1d] * K, axis=1),
         _block_diag_k(w1e, K), _block_diag_k(w1s, K), _block_diag_k(lp["w2"], K)],
        axis=0).astype(jnp.bfloat16)                           # (H + 3*3H, 3H) = (320, 96)

    w3s = jnp.concatenate([lp["w3"]] * K, axis=0) / float(K)   # mean over K folded in
    wn = jnp.concatenate([w3s, sp["w"], lp["wd2"]],
                         axis=0).astype(jnp.bfloat16)          # (3H + H + 4H, H) = (256, 32)

    if read_w is None:
        rw_pad = jnp.zeros((H, LANE), jnp.float32)
        rb_pad = jnp.zeros((1, LANE), jnp.float32)
    else:
        rw_pad = jnp.zeros((H, LANE), jnp.float32).at[:, :read_w.shape[1]].set(read_w)
        rb_pad = jnp.zeros((1, LANE), jnp.float32).at[:, :read_b.shape[1]].set(read_b)
    wf = jnp.concatenate([lp["wd1"], rw_pad], axis=0).astype(jnp.bfloat16)   # (2H, 128)

    rows = [
        _pad_vec(jnp.concatenate([lp["b1"]] * K, axis=1)),     # 0: b1 tiled to 96
        _pad_vec(jnp.concatenate([lp["b2"]] * K, axis=1)),     # 1: b2 tiled to 96
        _pad_vec(lp["b3"]),                                    # 2
        _pad_vec(lp["ln1_g"]), _pad_vec(lp["ln1_b"]),          # 3, 4
        _pad_vec(lp["bd1"]),                                   # 5
        _pad_vec(lp["bd2"]),                                   # 6
        _pad_vec(lp["ln2_g"]), _pad_vec(lp["ln2_b"]),          # 7, 8
        _pad_vec(sp["b"]),                                     # 9
        _pad_vec(sp["ln_g"]), _pad_vec(sp["ln_b"]),            # 10, 11
        rb_pad,                                                # 12
    ]
    vv = jnp.concatenate(rows + [jnp.zeros((16 - len(rows), LANE), jnp.float32)], axis=0)
    return wn, ww, wf, vv


# ----------------------------- plain-JAX glue -----------------------------

def rna_features(params, X, S, mask):
    # TODO(synk): RNAFeatures source is not part of the provided module; approximated
    # deterministically (kNN graph from coords + RBF edge featurization) with the
    # same output signature (X, S, h_V, h_E, E_idx, batch_id).
    B, L, _ = X.shape
    N = B * L
    coords = X.reshape(N, 3)
    S_flat = S.reshape(N)
    mask_flat = mask.reshape(N)
    batch_id = jnp.repeat(jnp.arange(B, dtype=jnp.int32), L)

    d = jnp.linalg.norm(X[:, :, None, :] - X[:, None, :, :], axis=-1)       # (B,L,L)
    d = d + jnp.eye(L, dtype=d.dtype)[None] * 1e9                           # no self-edge
    _, nbr = jax.lax.top_k(-d, K_NEIGHBORS)                                 # k nearest, O(L*K)
    base = (jnp.arange(B) * L)[:, None, None]
    src = (base + nbr).reshape(-1).astype(jnp.int32)                        # neighbour (global)
    dst = jnp.repeat(jnp.arange(N, dtype=jnp.int32), K_NEIGHBORS)           # centre   (global)
    E_idx = jnp.stack([dst, src], axis=0)

    h_V = (params["W_s"][S_flat] + coords @ params["w_node"]) * mask_flat[:, None]
    e_d = jnp.linalg.norm(coords[E_idx[1]] - coords[E_idx[0]], axis=-1, keepdims=True)
    centers = jnp.linspace(0.0, 3.0, RBF_DIM, dtype=jnp.float32)[None, :]
    rbf = jnp.exp(-((e_d - centers) / 0.3) ** 2)
    h_E = rbf @ params["w_edge"] + params["b_edge"]
    return X, S_flat, h_V.astype(jnp.float32), h_E.astype(jnp.float32), E_idx, batch_id, mask_flat


@jax.jit
def model_forward(params, X, S, mask):
    _, S_flat, h_V, h_E, E_idx, batch_id, mask_flat = rna_features(params, X, S, mask)
    N, H = h_V.shape
    K = K_NEIGHBORS
    B = X.shape[0]                                   # static, no host sync

    tile, N_pad = _pick_tile(N)
    pad_n = N_pad - N

    # Edges are dst-major: rows [n*K, (n+1)*K) belong to node n, so each edge
    # tensor becomes one lane-dense (N, K*H) slab aligned with the node axis.
    # Activation streams are bf16 (matmul operands); h_V residual stream is f32.
    h_V_pad = jnp.pad(h_V, ((0, pad_n), (0, 0)))
    hE_slab = jnp.pad(h_E.reshape(N, K * H).astype(jnp.bfloat16), ((0, pad_n), (0, 0)))
    src_pad = jnp.pad(E_idx[1].reshape(N, K), ((0, pad_n), (0, 0)))   # padded rows -> node 0 (sliced off later)

    layer_params = (list(zip(params["enc_layers"], params["enc_skips"]))
                    + list(zip(params["dec_layers"], params["dec_skips"])))
    n_layers = len(layer_params)
    logits_pad = None
    for li, (lp, sp) in enumerate(layer_params):
        last = li == n_layers - 1
        if last:
            wn, ww, wf, vv = pack_layer_weights(lp, sp, params["read_w"], params["read_b"])
        else:
            wn, ww, wf, vv = pack_layer_weights(lp, sp)
        # Neighbour gather stays in XLA (data-dependent index) but streams bf16.
        hS_slab = h_V_pad[src_pad].astype(jnp.bfloat16).reshape(N_pad, K * H)
        if last:
            h_V_pad, logits_pad = fused_layer(h_V_pad, hE_slab, hS_slab,
                                              wn, ww, wf, vv, tile, with_readout=True)
        else:
            h_V_pad = fused_layer(h_V_pad, hE_slab, hS_slab, wn, ww, wf, vv, tile)

    h_V_out = h_V_pad[:N]

    # graph pooling (mask-weighted segment mean) + projection head: tiny, left to XLA
    w = mask_flat[:, None]
    cnt = jax.ops.segment_sum(w, batch_id, num_segments=B)
    graph_embs = jax.ops.segment_sum(h_V_out * w, batch_id, num_segments=B) / jnp.maximum(cnt, 1.0)
    graph_prjs = (jnp.maximum(graph_embs @ params["proj_w1"], 0.0)
                  @ params["proj_w2"] + params["proj_b2"])

    logits = logits_pad[:N, :VOCAB]                  # lane-dense store in-kernel, sliced here
    return logits, S_flat, graph_prjs


# ----------------------------- parameters -----------------------------

def xavier(key, fan_in, fan_out):
    bound = (6.0 / (fan_in + fan_out)) ** 0.5
    return jax.random.uniform(key, (fan_in, fan_out), jnp.float32, -bound, bound)


def make_params(key):
    keys = iter(jax.random.split(key, 64))
    H, H4, HE = HIDDEN, 4 * HIDDEN, 3 * HIDDEN
    p = {}
    p["W_s"] = jax.random.normal(next(keys), (VOCAB, H), jnp.float32)   # nn.Embedding
    p["w_node"] = xavier(next(keys), 3, H)
    p["w_edge"] = xavier(next(keys), RBF_DIM, H)
    p["b_edge"] = jnp.zeros((1, H), jnp.float32)

    def mpnn_params():
        return {
            "w1": xavier(next(keys), HE, H), "b1": jnp.zeros((1, H), jnp.float32),
            "w2": xavier(next(keys), H, H), "b2": jnp.zeros((1, H), jnp.float32),
            "w3": xavier(next(keys), H, H), "b3": jnp.zeros((1, H), jnp.float32),
            "ln1_g": jnp.ones((1, H), jnp.float32), "ln1_b": jnp.zeros((1, H), jnp.float32),
            "wd1": xavier(next(keys), H, H4), "bd1": jnp.zeros((1, H4), jnp.float32),
            "wd2": xavier(next(keys), H4, H), "bd2": jnp.zeros((1, H), jnp.float32),
            "ln2_g": jnp.ones((1, H), jnp.float32), "ln2_b": jnp.zeros((1, H), jnp.float32),
        }

    def skip_params():
        return {"w": xavier(next(keys), H, H), "b": jnp.zeros((1, H), jnp.float32),
                "ln_g": jnp.ones((1, H), jnp.float32), "ln_b": jnp.zeros((1, H), jnp.float32)}

    p["enc_layers"] = [mpnn_params() for _ in range(NUM_ENC)]
    p["enc_skips"] = [skip_params() for _ in range(NUM_ENC)]
    p["dec_layers"] = [mpnn_params() for _ in range(NUM_DEC)]
    p["dec_skips"] = [skip_params() for _ in range(NUM_DEC)]
    p["proj_w1"] = xavier(next(keys), H, H)          # bias=False
    p["proj_w2"] = xavier(next(keys), H, H)
    p["proj_b2"] = jnp.zeros((1, H), jnp.float32)
    p["read_w"] = xavier(next(keys), H, VOCAB)
    p["read_b"] = jnp.zeros((1, VOCAB), jnp.float32)
    return p


if __name__ == "__main__":
    key = jax.random.PRNGKey(0)
    kX, kS, kp = jax.random.split(key, 3)
    B, L = 2, 8
    X = jax.random.normal(kX, (B, L, 3), jnp.float32)             # coords
    S = jax.random.randint(kS, (B, L), 0, VOCAB)                  # sequence tokens
    mask = jnp.ones((B, L), jnp.float32)
    params = make_params(kp)

    logits, S_out, graph_prjs = model_forward(params, X, S, mask)
    jax.block_until_ready((logits, S_out, graph_prjs))
    assert logits.shape == (B * L, VOCAB)
    assert graph_prjs.shape == (B, HIDDEN)
    print("KERNEL_OK")
</pallas_src>

<mosaic_0001>
module attributes {stable_mosaic.version = 11 : i64} {
  func.func private @main(%arg0: i32) attributes {dimension_semantics = [#tpu.dimension_semantics<core_parallel>], iteration_bounds = array<i64: 2>, tpu.core_type = #tpu.core_type<sc_scalar_subcore>, window_params = []} {
    return
  }
}

module attributes {stable_mosaic.version = 11 : i64} {
  func.func private @main(%arg0: i32) attributes {dimension_semantics = [#tpu.dimension_semantics<core_parallel>], iteration_bounds = array<i64: 2>, tpu.core_type = #tpu.core_type<sc_scalar_subcore>, window_params = []} {
    return
  }
}

module attributes {stable_mosaic.version = 11 : i64} {
  func.func @_fused_layer_kernel(%arg0: i32, %arg1: memref<16x32xf32, #tpu.memory_space<vmem>>, %arg2: memref<16x96xbf16, #tpu.memory_space<vmem>>, %arg3: memref<16x96xbf16, #tpu.memory_space<vmem>>, %arg4: memref<256x32xbf16, #tpu.memory_space<vmem>>, %arg5: memref<320x96xbf16, #tpu.memory_space<vmem>>, %arg6: memref<64x128xbf16, #tpu.memory_space<vmem>>, %arg7: memref<16x128xf32, #tpu.memory_space<vmem>>, %arg8: memref<16x32xf32, #tpu.memory_space<vmem>>) attributes {dimension_semantics = [#tpu.dimension_semantics<parallel>], iteration_bounds = array<i64: 1>, scalar_prefetch = 0 : i64, scratch_operands = 0 : i64, tpu.core_type = #tpu.core_type<tc>, window_params = [{transform_indices = @transform_0, window_bounds = array<i64: 16, 32>}, {transform_indices = @transform_1, window_bounds = array<i64: 16, 96>}, {transform_indices = @transform_2, window_bounds = array<i64: 16, 96>}, {pipeline_mode = #tpu.pipeline_mode<synchronous>, transform_indices = @transform_3, window_bounds = array<i64: 256, 32>}, {pipeline_mode = #tpu.pipeline_mode<synchronous>, transform_indices = @transform_4, window_bounds = array<i64: 320, 96>}, {pipeline_mode = #tpu.pipeline_mode<synchronous>, transform_indices = @transform_5, window_bounds = array<i64: 64, 128>}, {pipeline_mode = #tpu.pipeline_mode<synchronous>, transform_indices = @transform_6, window_bounds = array<i64: 16, 128>}, {transform_indices = @transform_7, window_bounds = array<i64: 16, 32>}]} {
    %c0 = arith.constant 0 : index
    %c0_0 = arith.constant 0 : index
    %0 = vector.load %arg1[%c0, %c0_0] : memref<16x32xf32, #tpu.memory_space<vmem>>, vector<16x32xf32>
    %1 = arith.truncf %0 : vector<16x32xf32> to vector<16x32xbf16>
    %c0_1 = arith.constant 0 : index
    %c0_2 = arith.constant 0 : index
    %2 = vector.load %arg5[%c0_1, %c0_2] : memref<320x96xbf16, #tpu.memory_space<vmem>>, vector<32x96xbf16>
    %c32 = arith.constant 32 : index
    %c0_3 = arith.constant 0 : index
    %3 = vector.load %arg5[%c32, %c0_3] : memref<320x96xbf16, #tpu.memory_space<vmem>>, vector<96x96xbf16>
    %c128 = arith.constant 128 : index
    %c0_4 = arith.constant 0 : index
    %4 = vector.load %arg5[%c128, %c0_4] : memref<320x96xbf16, #tpu.memory_space<vmem>>, vector<96x96xbf16>
    %c224 = arith.constant 224 : index
    %c0_5 = arith.constant 0 : index
    %5 = vector.load %arg5[%c224, %c0_5] : memref<320x96xbf16, #tpu.memory_space<vmem>>, vector<96x96xbf16>
    %c0_6 = arith.constant 0 : index
    %c0_7 = arith.constant 0 : index
    %6 = vector.load %arg4[%c0_6, %c0_7] : memref<256x32xbf16, #tpu.memory_space<vmem>>, vector<96x32xbf16>
    %c96 = arith.constant 96 : index
    %c0_8 = arith.constant 0 : index
    %7 = vector.load %arg4[%c96, %c0_8] : memref<256x32xbf16, #tpu.memory_space<vmem>>, vector<32x32xbf16>
    %c128_9 = arith.constant 128 : index
    %c0_10 = arith.constant 0 : index
    %8 = vector.load %arg4[%c128_9, %c0_10] : memref<256x32xbf16, #tpu.memory_space<vmem>>, vector<128x32xbf16>
    %c0_11 = arith.constant 0 : index
    %c0_12 = arith.constant 0 : index
    %9 = vector.load %arg6[%c0_11, %c0_12] : memref<64x128xbf16, #tpu.memory_space<vmem>>, vector<32x128xbf16>
    %c0_13 = arith.constant 0 : index
    %c0_14 = arith.constant 0 : index
    %10 = vector.load %arg7[%c0_13, %c0_14] : memref<16x128xf32, #tpu.memory_space<vmem>>, vector<16x128xf32>
    %11 = vector.extract_strided_slice %10 {offsets = [0, 0], sizes = [1, 96], strides = [1, 1]} : vector<16x128xf32> to vector<1x96xf32>
    %12 = vector.extract_strided_slice %10 {offsets = [1, 0], sizes = [1, 96], strides = [1, 1]} : vector<16x128xf32> to vector<1x96xf32>
    %13 = vector.extract_strided_slice %10 {offsets = [2, 0], sizes = [1, 32], strides = [1, 1]} : vector<16x128xf32> to vector<1x32xf32>
    %14 = vector.extract_strided_slice %10 {offsets = [3, 0], sizes = [1, 32], strides = [1, 1]} : vector<16x128xf32> to vector<1x32xf32>
    %15 = vector.extract_strided_slice %10 {offsets = [4, 0], sizes = [1, 32], strides = [1, 1]} : vector<16x128xf32> to vector<1x32xf32>
    %16 = vector.extract_strided_slice %10 {offsets = [5, 0], sizes = [1, 128], strides = [1, 1]} : vector<16x128xf32> to vector<1x128xf32>
    %17 = vector.extract_strided_slice %10 {offsets = [6, 0], sizes = [1, 32], strides = [1, 1]} : vector<16x128xf32> to vector<1x32xf32>
    %18 = vector.extract_strided_slice %10 {offsets = [7, 0], sizes = [1, 32], strides = [1, 1]} : vector<16x128xf32> to vector<1x32xf32>
    %19 = vector.extract_strided_slice %10 {offsets = [8, 0], sizes = [1, 32], strides = [1, 1]} : vector<16x128xf32> to vector<1x32xf32>
    %20 = vector.extract_strided_slice %10 {offsets = [9, 0], sizes = [1, 32], strides = [1, 1]} : vector<16x128xf32> to vector<1x32xf32>
    %21 = vector.extract_strided_slice %10 {offsets = [10, 0], sizes = [1, 32], strides = [1, 1]} : vector<16x128xf32> to vector<1x32xf32>
    %22 = vector.extract_strided_slice %10 {offsets = [11, 0], sizes = [1, 32], strides = [1, 1]} : vector<16x128xf32> to vector<1x32xf32>
    %c0_15 = arith.constant 0 : index
    %c0_16 = arith.constant 0 : index
    %23 = vector.load %arg2[%c0_15, %c0_16] : memref<16x96xbf16, #tpu.memory_space<vmem>>, vector<16x96xbf16>
    %cst = arith.constant dense<0.000000e+00> : vector<16x96xf32>
    %24 = tpu.matmul %23, %3, %cst {dimension_numbers = #tpu.dot_dimension_numbers<[1], [0], [0], [1], [0, 0, 1, 1], [], []>} : vector<16x96xbf16>, vector<96x96xbf16>, vector<16x96xf32> -> vector<16x96xf32>
    %c0_17 = arith.constant 0 : index
    %c0_18 = arith.constant 0 : index
    %25 = vector.load %arg3[%c0_17, %c0_18] : memref<16x96xbf16, #tpu.memory_space<vmem>>, vector<16x96xbf16>
    %cst_19 = arith.constant dense<0.000000e+00> : vector<16x96xf32>
    %26 = tpu.matmul %25, %4, %cst_19 {dimension_numbers = #tpu.dot_dimension_numbers<[1], [0], [0], [1], [0, 0, 1, 1], [], []>} : vector<16x96xbf16>, vector<96x96xbf16>, vector<16x96xf32> -> vector<16x96xf32>
    %27 = arith.addf %24, %26 : vector<16x96xf32>
    %cst_20 = arith.constant dense<0.000000e+00> : vector<16x96xf32>
    %28 = tpu.matmul %1, %2, %cst_20 {dimension_numbers = #tpu.dot_dimension_numbers<[1], [0], [0], [1], [0, 0, 1, 1], [], []>} : vector<16x32xbf16>, vector<32x96xbf16>, vector<16x96xf32> -> vector<16x96xf32>
    %29 = arith.addf %27, %28 : vector<16x96xf32>
    %30 = vector.broadcast %11 : vector<1x96xf32> to vector<16x96xf32>
    %31 = arith.addf %29, %30 : vector<16x96xf32>
    %cst_21 = arith.constant 0.000000e+00 : f32
    %32 = vector.broadcast %cst_21 : f32 to vector<16x96xf32>
    %33 = arith.maximumf %31, %32 : vector<16x96xf32>
    %34 = arith.truncf %33 : vector<16x96xf32> to vector<16x96xbf16>
    %cst_22 = arith.constant dense<0.000000e+00> : vector<16x96xf32>
    %35 = tpu.matmul %34, %5, %cst_22 {dimension_numbers = #tpu.dot_dimension_numbers<[1], [0], [0], [1], [0, 0, 1, 1], [], []>} : vector<16x96xbf16>, vector<96x96xbf16>, vector<16x96xf32> -> vector<16x96xf32>
    %36 = vector.broadcast %12 : vector<1x96xf32> to vector<16x96xf32>
    %37 = arith.addf %35, %36 : vector<16x96xf32>
    %cst_23 = arith.constant 0.000000e+00 : f32
    %38 = vector.broadcast %cst_23 : f32 to vector<16x96xf32>
    %39 = arith.maximumf %37, %38 : vector<16x96xf32>
    %40 = arith.truncf %39 : vector<16x96xf32> to vector<16x96xbf16>
    %cst_24 = arith.constant dense<0.000000e+00> : vector<16x32xf32>
    %41 = tpu.matmul %40, %6, %cst_24 {dimension_numbers = #tpu.dot_dimension_numbers<[1], [0], [0], [1], [0, 0, 1, 1], [], []>} : vector<16x96xbf16>, vector<96x32xbf16>, vector<16x32xf32> -> vector<16x32xf32>
    %42 = vector.broadcast %13 : vector<1x32xf32> to vector<16x32xf32>
    %43 = arith.addf %41, %42 : vector<16x32xf32>
    %44 = arith.addf %0, %43 : vector<16x32xf32>
    %cst_25 = arith.constant dense<0.000000e+00> : vector<16xf32>
    %45 = vector.multi_reduction <add>, %44, %cst_25 [1] : vector<16x32xf32> to vector<16xf32>
    %46 = vector.shape_cast %45 : vector<16xf32> to vector<16x1xf32>
    %cst_26 = arith.constant 3.200000e+01 : f32
    %47 = vector.broadcast %cst_26 : f32 to vector<16x1xf32>
    %48 = arith.divf %46, %47 : vector<16x1xf32>
    %49 = vector.broadcast %48 : vector<16x1xf32> to vector<16x32xf32>
    %50 = arith.subf %44, %49 : vector<16x32xf32>
    %51 = arith.mulf %50, %50 : vector<16x32xf32>
    %cst_27 = arith.constant dense<0.000000e+00> : vector<16xf32>
    %52 = vector.multi_reduction <add>, %51, %cst_27 [1] : vector<16x32xf32> to vector<16xf32>
    %53 = vector.shape_cast %52 : vector<16xf32> to vector<16x1xf32>
    %cst_28 = arith.constant 3.200000e+01 : f32
    %54 = vector.broadcast %cst_28 : f32 to vector<16x1xf32>
    %55 = arith.divf %53, %54 : vector<16x1xf32>
    %56 = vector.broadcast %48 : vector<16x1xf32> to vector<16x32xf32>
    %57 = arith.subf %44, %56 : vector<16x32xf32>
    %cst_29 = arith.constant 9.99999974E-6 : f32
    %58 = vector.broadcast %cst_29 : f32 to vector<16x1xf32>
    %59 = arith.addf %55, %58 : vector<16x1xf32>
    %60 = math.rsqrt %59 : vector<16x1xf32>
    %61 = vector.broadcast %60 : vector<16x1xf32> to vector<16x32xf32>
    %62 = arith.mulf %57, %61 : vector<16x32xf32>
    %63 = vector.broadcast %14 : vector<1x32xf32> to vector<16x32xf32>
    %64 = arith.mulf %62, %63 : vector<16x32xf32>
    %65 = vector.broadcast %15 : vector<1x32xf32> to vector<16x32xf32>
    %66 = arith.addf %64, %65 : vector<16x32xf32>
    %67 = arith.truncf %66 : vector<16x32xf32> to vector<16x32xbf16>
    %cst_30 = arith.constant dense<0.000000e+00> : vector<16x128xf32>
    %68 = tpu.matmul %67, %9, %cst_30 {dimension_numbers = #tpu.dot_dimension_numbers<[1], [0], [0], [1], [0, 0, 1, 1], [], []>} : vector<16x32xbf16>, vector<32x128xbf16>, vector<16x128xf32> -> vector<16x128xf32>
    %69 = vector.broadcast %16 : vector<1x128xf32> to vector<16x128xf32>
    %70 = arith.addf %68, %69 : vector<16x128xf32>
    %cst_31 = arith.constant 0.000000e+00 : f32
    %71 = vector.broadcast %cst_31 : f32 to vector<16x128xf32>
    %72 = arith.maximumf %70, %71 : vector<16x128xf32>
    %73 = arith.truncf %72 : vector<16x128xf32> to vector<16x128xbf16>
    %cst_32 = arith.constant dense<0.000000e+00> : vector<16x32xf32>
    %74 = tpu.matmul %73, %8, %cst_32 {dimension_numbers = #tpu.dot_dimension_numbers<[1], [0], [0], [1], [0, 0, 1, 1], [], []>} : vector<16x128xbf16>, vector<128x32xbf16>, vector<16x32xf32> -> vector<16x32xf32>
    %75 = vector.broadcast %17 : vector<1x32xf32> to vector<16x32xf32>
    %76 = arith.addf %74, %75 : vector<16x32xf32>
    %77 = arith.addf %66, %76 : vector<16x32xf32>
    %cst_33 = arith.constant dense<0.000000e+00> : vector<16xf32>
    %78 = vector.multi_reduction <add>, %77, %cst_33 [1] : vector<16x32xf32> to vector<16xf32>
    %79 = vector.shape_cast %78 : vector<16xf32> to vector<16x1xf32>
    %cst_34 = arith.constant 3.200000e+01 : f32
    %80 = vector.broadcast %cst_34 : f32 to vector<16x1xf32>
    %81 = arith.divf %79, %80 : vector<16x1xf32>
    %82 = vector.broadcast %81 : vector<16x1xf32> to vector<16x32xf32>
    %83 = arith.subf %77, %82 : vector<16x32xf32>
    %84 = arith.mulf %83, %83 : vector<16x32xf32>
    %cst_35 = arith.constant dense<0.000000e+00> : vector<16xf32>
    %85 = vector.multi_reduction <add>, %84, %cst_35 [1] : vector<16x32xf32> to vector<16xf32>
    %86 = vector.shape_cast %85 : vector<16xf32> to vector<16x1xf32>
    %cst_36 = arith.constant 3.200000e+01 : f32
    %87 = vector.broadcast %cst_36 : f32 to vector<16x1xf32>
    %88 = arith.divf %86, %87 : vector<16x1xf32>
    %89 = vector.broadcast %81 : vector<16x1xf32> to vector<16x32xf32>
    %90 = arith.subf %77, %89 : vector<16x32xf32>
    %cst_37 = arith.constant 9.99999974E-6 : f32
    %91 = vector.broadcast %cst_37 : f32 to vector<16x1xf32>
    %92 = arith.addf %88, %91 : vector<16x1xf32>
    %93 = math.rsqrt %92 : vector<16x1xf32>
    %94 = vector.broadcast %93 : vector<16x1xf32> to vector<16x32xf32>
    %95 = arith.mulf %90, %94 : vector<16x32xf32>
    %96 = vector.broadcast %18 : vector<1x32xf32> to vector<16x32xf32>
    %97 = arith.mulf %95, %96 : vector<16x32xf32>
    %98 = vector.broadcast %19 : vector<1x32xf32> to vector<16x32xf32>
    %99 = arith.addf %97, %98 : vector<16x32xf32>
    %100 = arith.truncf %99 : vector<16x32xf32> to vector<16x32xbf16>
    %cst_38 = arith.constant dense<0.000000e+00> : vector<16x32xf32>
    %101 = tpu.matmul %100, %7, %cst_38 {dimension_numbers = #tpu.dot_dimension_numbers<[1], [0], [0], [1], [0, 0, 1, 1], [], []>} : vector<16x32xbf16>, vector<32x32xbf16>, vector<16x32xf32> -> vector<16x32xf32>
    %102 = vector.broadcast %20 : vector<1x32xf32> to vector<16x32xf32>
    %103 = arith.addf %101, %102 : vector<16x32xf32>
    %cst_39 = arith.constant 0.000000e+00 : f32
    %104 = vector.broadcast %cst_39 : f32 to vector<16x32xf32>
    %105 = arith.maximumf %103, %104 : vector<16x32xf32>
    %cst_40 = arith.constant dense<0.000000e+00> : vector<16xf32>
    %106 = vector.multi_reduction <add>, %105, %cst_40 [1] : vector<16x32xf32> to vector<16xf32>
    %107 = vector.shape_cast %106 : vector<16xf32> to vector<16x1xf32>
    %cst_41 = arith.constant 3.200000e+01 : f32
    %108 = vector.broadcast %cst_41 : f32 to vector<16x1xf32>
    %109 = arith.divf %107, %108 : vector<16x1xf32>
    %110 = vector.broadcast %109 : vector<16x1xf32> to vector<16x32xf32>
    %111 = arith.subf %105, %110 : vector<16x32xf32>
    %112 = arith.mulf %111, %111 : vector<16x32xf32>
    %cst_42 = arith.constant dense<0.000000e+00> : vector<16xf32>
    %113 = vector.multi_reduction <add>, %112, %cst_42 [1] : vector<16x32xf32> to vector<16xf32>
    %114 = vector.shape_cast %113 : vector<16xf32> to vector<16x1xf32>
    %cst_43 = arith.constant 3.200000e+01 : f32
    %115 = vector.broadcast %cst_43 : f32 to vector<16x1xf32>
    %116 = arith.divf %114, %115 : vector<16x1xf32>
    %117 = vector.broadcast %109 : vector<16x1xf32> to vector<16x32xf32>
    %118 = arith.subf %105, %117 : vector<16x32xf32>
    %cst_44 = arith.constant 9.99999974E-6 : f32
    %119 = vector.broadcast %cst_44 : f32 to vector<16x1xf32>
    %120 = arith.addf %116, %119 : vector<16x1xf32>
    %121 = math.rsqrt %120 : vector<16x1xf32>
    %122 = vector.broadcast %121 : vector<16x1xf32> to vector<16x32xf32>
    %123 = arith.mulf %118, %122 : vector<16x32xf32>
    %124 = vector.broadcast %21 : vector<1x32xf32> to vector<16x32xf32>
    %125 = arith.mulf %123, %124 : vector<16x32xf32>
    %126 = vector.broadcast %22 : vector<1x32xf32> to vector<16x32xf32>
    %127 = arith.addf %125, %126 : vector<16x32xf32>
    %128 = arith.addf %0, %127 : vector<16x32xf32>
    %c0_45 = arith.constant 0 : index
    %c0_46 = arith.constant 0 : index
    %129 = vector.load %arg8[%c0_45, %c0_46] : memref<16x32xf32, #tpu.memory_space<vmem>>, vector<16x32xf32>
    tpu.vector_store %arg8[%c0_45, %c0_46], %128 {strides = array<i32>} : memref<16x32xf32, #tpu.memory_space<vmem>>, vector<16x32xf32>,
    return
  }
  func.func @transform_0(%arg0: i32) -> (i32, i32) {
    %c0_i32 = arith.constant 0 : i32
    %c0_i32_0 = arith.constant 0 : i32
    return %arg0, %c0_i32 : i32, i32
  }
  func.func @transform_1(%arg0: i32) -> (i32, i32) {
    %c0_i32 = arith.constant 0 : i32
    %c0_i32_0 = arith.constant 0 : i32
    return %arg0, %c0_i32 : i32, i32
  }
  func.func @transform_2(%arg0: i32) -> (i32, i32) {
    %c0_i32 = arith.constant 0 : i32
    %c0_i32_0 = arith.constant 0 : i32
    return %arg0, %c0_i32 : i32, i32
  }
  func.func @transform_3(%arg0: i32) -> (i32, i32) {
    %c0_i32 = arith.constant 0 : i32
    %c0_i32_0 = arith.constant 0 : i32
    %c0_i32_1 = arith.constant 0 : i32
    return %c0_i32, %c0_i32_0 : i32, i32
  }
  func.func @transform_4(%arg0: i32) -> (i32, i32) {
    %c0_i32 = arith.constant 0 : i32
    %c0_i32_0 = arith.constant 0 : i32
    %c0_i32_1 = arith.constant 0 : i32
    return %c0_i32, %c0_i32_0 : i32, i32
  }
  func.func @transform_5(%arg0: i32) -> (i32, i32) {
    %c0_i32 = arith.constant 0 : i32
    %c0_i32_0 = arith.constant 0 : i32
    %c0_i32_1 = arith.constant 0 : i32
    return %c0_i32, %c0_i32_0 : i32, i32
  }
  func.func @transform_6(%arg0: i32) -> (i32, i32) {
    %c0_i32 = arith.constant 0 : i32
    %c0_i32_0 = arith.constant 0 : i32
    %c0_i32_1 = arith.constant 0 : i32
    return %c0_i32, %c0_i32_0 : i32, i32
  }
  func.func @transform_7(%arg0: i32) -> (i32, i32) {
    %c0_i32 = arith.constant 0 : i32
    %c0_i32_0 = arith.constant 0 : i32
    return %arg0, %c0_i32 : i32, i32
  }
}

module attributes {stable_mosaic.version = 11 : i64} {
  func.func @_fused_layer_kernel(%arg0: i32, %arg1: memref<16x32xf32, #tpu.memory_space<vmem>>, %arg2: memref<16x96xbf16, #tpu.memory_space<vmem>>, %arg3: memref<16x96xbf16, #tpu.memory_space<vmem>>, %arg4: memref<256x32xbf16, #tpu.memory_space<vmem>>, %arg5: memref<320x96xbf16, #tpu.memory_space<vmem>>, %arg6: memref<64x128xbf16, #tpu.memory_space<vmem>>, %arg7: memref<16x128xf32, #tpu.memory_space<vmem>>, %arg8: memref<16x32xf32, #tpu.memory_space<vmem>>, %arg9: memref<16x128xf32, #tpu.memory_space<vmem>>) attributes {dimension_semantics = [#tpu.dimension_semantics<parallel>], iteration_bounds = array<i64: 1>, scalar_prefetch = 0 : i64, scratch_operands = 0 : i64, tpu.core_type = #tpu.core_type<tc>, window_params = [{transform_indices = @transform_0, window_bounds = array<i64: 16, 32>}, {transform_indices = @transform_1, window_bounds = array<i64: 16, 96>}, {transform_indices = @transform_2, window_bounds = array<i64: 16, 96>}, {pipeline_mode = #tpu.pipeline_mode<synchronous>, transform_indices = @transform_3, window_bounds = array<i64: 256, 32>}, {pipeline_mode = #tpu.pipeline_mode<synchronous>, transform_indices = @transform_4, window_bounds = array<i64: 320, 96>}, {pipeline_mode = #tpu.pipeline_mode<synchronous>, transform_indices = @transform_5, window_bounds = array<i64: 64, 128>}, {pipeline_mode = #tpu.pipeline_mode<synchronous>, transform_indices = @transform_6, window_bounds = array<i64: 16, 128>}, {transform_indices = @transform_7, window_bounds = array<i64: 16, 32>}, {transform_indices = @transform_8, window_bounds = array<i64: 16, 128>}]} {
    %c0 = arith.constant 0 : index
    %c0_0 = arith.constant 0 : index
    %0 = vector.load %arg1[%c0, %c0_0] : memref<16x32xf32, #tpu.memory_space<vmem>>, vector<16x32xf32>
    %1 = arith.truncf %0 : vector<16x32xf32> to vector<16x32xbf16>
    %c0_1 = arith.constant 0 : index
    %c0_2 = arith.constant 0 : index
    %2 = vector.load %arg5[%c0_1, %c0_2] : memref<320x96xbf16, #tpu.memory_space<vmem>>, vector<32x96xbf16>
    %c32 = arith.constant 32 : index
    %c0_3 = arith.constant 0 : index
    %3 = vector.load %arg5[%c32, %c0_3] : memref<320x96xbf16, #tpu.memory_space<vmem>>, vector<96x96xbf16>
    %c128 = arith.constant 128 : index
    %c0_4 = arith.constant 0 : index
    %4 = vector.load %arg5[%c128, %c0_4] : memref<320x96xbf16, #tpu.memory_space<vmem>>, vector<96x96xbf16>
    %c224 = arith.constant 224 : index
    %c0_5 = arith.constant 0 : index
    %5 = vector.load %arg5[%c224, %c0_5] : memref<320x96xbf16, #tpu.memory_space<vmem>>, vector<96x96xbf16>
    %c0_6 = arith.constant 0 : index
    %c0_7 = arith.constant 0 : index
    %6 = vector.load %arg4[%c0_6, %c0_7] : memref<256x32xbf16, #tpu.memory_space<vmem>>, vector<96x32xbf16>
    %c96 = arith.constant 96 : index
    %c0_8 = arith.constant 0 : index
    %7 = vector.load %arg4[%c96, %c0_8] : memref<256x32xbf16, #tpu.memory_space<vmem>>, vector<32x32xbf16>
    %c128_9 = arith.constant 128 : index
    %c0_10 = arith.constant 0 : index
    %8 = vector.load %arg4[%c128_9, %c0_10] : memref<256x32xbf16, #tpu.memory_space<vmem>>, vector<128x32xbf16>
    %c0_11 = arith.constant 0 : index
    %c0_12 = arith.constant 0 : index
    %9 = vector.load %arg6[%c0_11, %c0_12] : memref<64x128xbf16, #tpu.memory_space<vmem>>, vector<32x128xbf16>
    %c0_13 = arith.constant 0 : index
    %c0_14 = arith.constant 0 : index
    %10 = vector.load %arg7[%c0_13, %c0_14] : memref<16x128xf32, #tpu.memory_space<vmem>>, vector<16x128xf32>
    %11 = vector.extract_strided_slice %10 {offsets = [0, 0], sizes = [1, 96], strides = [1, 1]} : vector<16x128xf32> to vector<1x96xf32>
    %12 = vector.extract_strided_slice %10 {offsets = [1, 0], sizes = [1, 96], strides = [1, 1]} : vector<16x128xf32> to vector<1x96xf32>
    %13 = vector.extract_strided_slice %10 {offsets = [2, 0], sizes = [1, 32], strides = [1, 1]} : vector<16x128xf32> to vector<1x32xf32>
    %14 = vector.extract_strided_slice %10 {offsets = [3, 0], sizes = [1, 32], strides = [1, 1]} : vector<16x128xf32> to vector<1x32xf32>
    %15 = vector.extract_strided_slice %10 {offsets = [4, 0], sizes = [1, 32], strides = [1, 1]} : vector<16x128xf32> to vector<1x32xf32>
    %16 = vector.extract_strided_slice %10 {offsets = [5, 0], sizes = [1, 128], strides = [1, 1]} : vector<16x128xf32> to vector<1x128xf32>
    %17 = vector.extract_strided_slice %10 {offsets = [6, 0], sizes = [1, 32], strides = [1, 1]} : vector<16x128xf32> to vector<1x32xf32>
    %18 = vector.extract_strided_slice %10 {offsets = [7, 0], sizes = [1, 32], strides = [1, 1]} : vector<16x128xf32> to vector<1x32xf32>
    %19 = vector.extract_strided_slice %10 {offsets = [8, 0], sizes = [1, 32], strides = [1, 1]} : vector<16x128xf32> to vector<1x32xf32>
    %20 = vector.extract_strided_slice %10 {offsets = [9, 0], sizes = [1, 32], strides = [1, 1]} : vector<16x128xf32> to vector<1x32xf32>
    %21 = vector.extract_strided_slice %10 {offsets = [10, 0], sizes = [1, 32], strides = [1, 1]} : vector<16x128xf32> to vector<1x32xf32>
    %22 = vector.extract_strided_slice %10 {offsets = [11, 0], sizes = [1, 32], strides = [1, 1]} : vector<16x128xf32> to vector<1x32xf32>
    %c0_15 = arith.constant 0 : index
    %c0_16 = arith.constant 0 : index
    %23 = vector.load %arg2[%c0_15, %c0_16] : memref<16x96xbf16, #tpu.memory_space<vmem>>, vector<16x96xbf16>
    %cst = arith.constant dense<0.000000e+00> : vector<16x96xf32>
    %24 = tpu.matmul %23, %3, %cst {dimension_numbers = #tpu.dot_dimension_numbers<[1], [0], [0], [1], [0, 0, 1, 1], [], []>} : vector<16x96xbf16>, vector<96x96xbf16>, vector<16x96xf32> -> vector<16x96xf32>
    %c0_17 = arith.constant 0 : index
    %c0_18 = arith.constant 0 : index
    %25 = vector.load %arg3[%c0_17, %c0_18] : memref<16x96xbf16, #tpu.memory_space<vmem>>, vector<16x96xbf16>
    %cst_19 = arith.constant dense<0.000000e+00> : vector<16x96xf32>
    %26 = tpu.matmul %25, %4, %cst_19 {dimension_numbers = #tpu.dot_dimension_numbers<[1], [0], [0], [1], [0, 0, 1, 1], [], []>} : vector<16x96xbf16>, vector<96x96xbf16>, vector<16x96xf32> -> vector<16x96xf32>
    %27 = arith.addf %24, %26 : vector<16x96xf32>
    %cst_20 = arith.constant dense<0.000000e+00> : vector<16x96xf32>
    %28 = tpu.matmul %1, %2, %cst_20 {dimension_numbers = #tpu.dot_dimension_numbers<[1], [0], [0], [1], [0, 0, 1, 1], [], []>} : vector<16x32xbf16>, vector<32x96xbf16>, vector<16x96xf32> -> vector<16x96xf32>
    %29 = arith.addf %27, %28 : vector<16x96xf32>
    %30 = vector.broadcast %11 : vector<1x96xf32> to vector<16x96xf32>
    %31 = arith.addf %29, %30 : vector<16x96xf32>
    %cst_21 = arith.constant 0.000000e+00 : f32
    %32 = vector.broadcast %cst_21 : f32 to vector<16x96xf32>
    %33 = arith.maximumf %31, %32 : vector<16x96xf32>
    %34 = arith.truncf %33 : vector<16x96xf32> to vector<16x96xbf16>
    %cst_22 = arith.constant dense<0.000000e+00> : vector<16x96xf32>
    %35 = tpu.matmul %34, %5, %cst_22 {dimension_numbers = #tpu.dot_dimension_numbers<[1], [0], [0], [1], [0, 0, 1, 1], [], []>} : vector<16x96xbf16>, vector<96x96xbf16>, vector<16x96xf32> -> vector<16x96xf32>
    %36 = vector.broadcast %12 : vector<1x96xf32> to vector<16x96xf32>
    %37 = arith.addf %35, %36 : vector<16x96xf32>
    %cst_23 = arith.constant 0.000000e+00 : f32
    %38 = vector.broadcast %cst_23 : f32 to vector<16x96xf32>
    %39 = arith.maximumf %37, %38 : vector<16x96xf32>
    %40 = arith.truncf %39 : vector<16x96xf32> to vector<16x96xbf16>
    %cst_24 = arith.constant dense<0.000000e+00> : vector<16x32xf32>
    %41 = tpu.matmul %40, %6, %cst_24 {dimension_numbers = #tpu.dot_dimension_numbers<[1], [0], [0], [1], [0, 0, 1, 1], [], []>} : vector<16x96xbf16>, vector<96x32xbf16>, vector<16x32xf32> -> vector<16x32xf32>
    %42 = vector.broadcast %13 : vector<1x32xf32> to vector<16x32xf32>
    %43 = arith.addf %41, %42 : vector<16x32xf32>
    %44 = arith.addf %0, %43 : vector<16x32xf32>
    %cst_25 = arith.constant dense<0.000000e+00> : vector<16xf32>
    %45 = vector.multi_reduction <add>, %44, %cst_25 [1] : vector<16x32xf32> to vector<16xf32>
    %46 = vector.shape_cast %45 : vector<16xf32> to vector<16x1xf32>
    %cst_26 = arith.constant 3.200000e+01 : f32
    %47 = vector.broadcast %cst_26 : f32 to vector<16x1xf32>
    %48 = arith.divf %46, %47 : vector<16x1xf32>
    %49 = vector.broadcast %48 : vector<16x1xf32> to vector<16x32xf32>
    %50 = arith.subf %44, %49 : vector<16x32xf32>
    %51 = arith.mulf %50, %50 : vector<16x32xf32>
    %cst_27 = arith.constant dense<0.000000e+00> : vector<16xf32>
    %52 = vector.multi_reduction <add>, %51, %cst_27 [1] : vector<16x32xf32> to vector<16xf32>
    %53 = vector.shape_cast %52 : vector<16xf32> to vector<16x1xf32>
    %cst_28 = arith.constant 3.200000e+01 : f32
    %54 = vector.broadcast %cst_28 : f32 to vector<16x1xf32>
    %55 = arith.divf %53, %54 : vector<16x1xf32>
    %56 = vector.broadcast %48 : vector<16x1xf32> to vector<16x32xf32>
    %57 = arith.subf %44, %56 : vector<16x32xf32>
    %cst_29 = arith.constant 9.99999974E-6 : f32
    %58 = vector.broadcast %cst_29 : f32 to vector<16x1xf32>
    %59 = arith.addf %55, %58 : vector<16x1xf32>
    %60 = math.rsqrt %59 : vector<16x1xf32>
    %61 = vector.broadcast %60 : vector<16x1xf32> to vector<16x32xf32>
    %62 = arith.mulf %57, %61 : vector<16x32xf32>
    %63 = vector.broadcast %14 : vector<1x32xf32> to vector<16x32xf32>
    %64 = arith.mulf %62, %63 : vector<16x32xf32>
    %65 = vector.broadcast %15 : vector<1x32xf32> to vector<16x32xf32>
    %66 = arith.addf %64, %65 : vector<16x32xf32>
    %67 = arith.truncf %66 : vector<16x32xf32> to vector<16x32xbf16>
    %cst_30 = arith.constant dense<0.000000e+00> : vector<16x128xf32>
    %68 = tpu.matmul %67, %9, %cst_30 {dimension_numbers = #tpu.dot_dimension_numbers<[1], [0], [0], [1], [0, 0, 1, 1], [], []>} : vector<16x32xbf16>, vector<32x128xbf16>, vector<16x128xf32> -> vector<16x128xf32>
    %69 = vector.broadcast %16 : vector<1x128xf32> to vector<16x128xf32>
    %70 = arith.addf %68, %69 : vector<16x128xf32>
    %cst_31 = arith.constant 0.000000e+00 : f32
    %71 = vector.broadcast %cst_31 : f32 to vector<16x128xf32>
    %72 = arith.maximumf %70, %71 : vector<16x128xf32>
    %73 = arith.truncf %72 : vector<16x128xf32> to vector<16x128xbf16>
    %cst_32 = arith.constant dense<0.000000e+00> : vector<16x32xf32>
    %74 = tpu.matmul %73, %8, %cst_32 {dimension_numbers = #tpu.dot_dimension_numbers<[1], [0], [0], [1], [0, 0, 1, 1], [], []>} : vector<16x128xbf16>, vector<128x32xbf16>, vector<16x32xf32> -> vector<16x32xf32>
    %75 = vector.broadcast %17 : vector<1x32xf32> to vector<16x32xf32>
    %76 = arith.addf %74, %75 : vector<16x32xf32>
    %77 = arith.addf %66, %76 : vector<16x32xf32>
    %cst_33 = arith.constant dense<0.000000e+00> : vector<16xf32>
    %78 = vector.multi_reduction <add>, %77, %cst_33 [1] : vector<16x32xf32> to vector<16xf32>
    %79 = vector.shape_cast %78 : vector<16xf32> to vector<16x1xf32>
    %cst_34 = arith.constant 3.200000e+01 : f32
    %80 = vector.broadcast %cst_34 : f32 to vector<16x1xf32>
    %81 = arith.divf %79, %80 : vector<16x1xf32>
    %82 = vector.broadcast %81 : vector<16x1xf32> to vector<16x32xf32>
    %83 = arith.subf %77, %82 : vector<16x32xf32>
    %84 = arith.mulf %83, %83 : vector<16x32xf32>
    %cst_35 = arith.constant dense<0.000000e+00> : vector<16xf32>
    %85 = vector.multi_reduction <add>, %84, %cst_35 [1] : vector<16x32xf32> to vector<16xf32>
    %86 = vector.shape_cast %85 : vector<16xf32> to vector<16x1xf32>
    %cst_36 = arith.constant 3.200000e+01 : f32
    %87 = vector.broadcast %cst_36 : f32 to vector<16x1xf32>
    %88 = arith.divf %86, %87 : vector<16x1xf32>
    %89 = vector.broadcast %81 : vector<16x1xf32> to vector<16x32xf32>
    %90 = arith.subf %77, %89 : vector<16x32xf32>
    %cst_37 = arith.constant 9.99999974E-6 : f32
    %91 = vector.broadcast %cst_37 : f32 to vector<16x1xf32>
    %92 = arith.addf %88, %91 : vector<16x1xf32>
    %93 = math.rsqrt %92 : vector<16x1xf32>
    %94 = vector.broadcast %93 : vector<16x1xf32> to vector<16x32xf32>
    %95 = arith.mulf %90, %94 : vector<16x32xf32>
    %96 = vector.broadcast %18 : vector<1x32xf32> to vector<16x32xf32>
    %97 = arith.mulf %95, %96 : vector<16x32xf32>
    %98 = vector.broadcast %19 : vector<1x32xf32> to vector<16x32xf32>
    %99 = arith.addf %97, %98 : vector<16x32xf32>
    %100 = arith.truncf %99 : vector<16x32xf32> to vector<16x32xbf16>
    %cst_38 = arith.constant dense<0.000000e+00> : vector<16x32xf32>
    %101 = tpu.matmul %100, %7, %cst_38 {dimension_numbers = #tpu.dot_dimension_numbers<[1], [0], [0], [1], [0, 0, 1, 1], [], []>} : vector<16x32xbf16>, vector<32x32xbf16>, vector<16x32xf32> -> vector<16x32xf32>
    %102 = vector.broadcast %20 : vector<1x32xf32> to vector<16x32xf32>
    %103 = arith.addf %101, %102 : vector<16x32xf32>
    %cst_39 = arith.constant 0.000000e+00 : f32
    %104 = vector.broadcast %cst_39 : f32 to vector<16x32xf32>
    %105 = arith.maximumf %103, %104 : vector<16x32xf32>
    %cst_40 = arith.constant dense<0.000000e+00> : vector<16xf32>
    %106 = vector.multi_reduction <add>, %105, %cst_40 [1] : vector<16x32xf32> to vector<16xf32>
    %107 = vector.shape_cast %106 : vector<16xf32> to vector<16x1xf32>
    %cst_41 = arith.constant 3.200000e+01 : f32
    %108 = vector.broadcast %cst_41 : f32 to vector<16x1xf32>
    %109 = arith.divf %107, %108 : vector<16x1xf32>
    %110 = vector.broadcast %109 : vector<16x1xf32> to vector<16x32xf32>
    %111 = arith.subf %105, %110 : vector<16x32xf32>
    %112 = arith.mulf %111, %111 : vector<16x32xf32>
    %cst_42 = arith.constant dense<0.000000e+00> : vector<16xf32>
    %113 = vector.multi_reduction <add>, %112, %cst_42 [1] : vector<16x32xf32> to vector<16xf32>
    %114 = vector.shape_cast %113 : vector<16xf32> to vector<16x1xf32>
    %cst_43 = arith.constant 3.200000e+01 : f32
    %115 = vector.broadcast %cst_43 : f32 to vector<16x1xf32>
    %116 = arith.divf %114, %115 : vector<16x1xf32>
    %117 = vector.broadcast %109 : vector<16x1xf32> to vector<16x32xf32>
    %118 = arith.subf %105, %117 : vector<16x32xf32>
    %cst_44 = arith.constant 9.99999974E-6 : f32
    %119 = vector.broadcast %cst_44 : f32 to vector<16x1xf32>
    %120 = arith.addf %116, %119 : vector<16x1xf32>
    %121 = math.rsqrt %120 : vector<16x1xf32>
    %122 = vector.broadcast %121 : vector<16x1xf32> to vector<16x32xf32>
    %123 = arith.mulf %118, %122 : vector<16x32xf32>
    %124 = vector.broadcast %21 : vector<1x32xf32> to vector<16x32xf32>
    %125 = arith.mulf %123, %124 : vector<16x32xf32>
    %126 = vector.broadcast %22 : vector<1x32xf32> to vector<16x32xf32>
    %127 = arith.addf %125, %126 : vector<16x32xf32>
    %128 = arith.addf %0, %127 : vector<16x32xf32>
    %c0_45 = arith.constant 0 : index
    %c0_46 = arith.constant 0 : index
    %129 = vector.load %arg8[%c0_45, %c0_46] : memref<16x32xf32, #tpu.memory_space<vmem>>, vector<16x32xf32>
    tpu.vector_store %arg8[%c0_45, %c0_46], %128 {strides = array<i32>} : memref<16x32xf32, #tpu.memory_space<vmem>>, vector<16x32xf32>,
    %c32_47 = arith.constant 32 : index
    %c0_48 = arith.constant 0 : index
    %130 = vector.load %arg6[%c32_47, %c0_48] : memref<64x128xbf16, #tpu.memory_space<vmem>>, vector<32x128xbf16>
    %131 = vector.extract_strided_slice %10 {offsets = [12, 0], sizes = [1, 128], strides = [1, 1]} : vector<16x128xf32> to vector<1x128xf32>
    %132 = arith.truncf %128 : vector<16x32xf32> to vector<16x32xbf16>
    %cst_49 = arith.constant dense<0.000000e+00> : vector<16x128xf32>
    %133 = tpu.matmul %132, %130, %cst_49 {dimension_numbers = #tpu.dot_dimension_numbers<[1], [0], [0], [1], [0, 0, 1, 1], [], []>} : vector<16x32xbf16>, vector<32x128xbf16>, vector<16x128xf32> -> vector<16x128xf32>
    %134 = vector.broadcast %131 : vector<1x128xf32> to vector<16x128xf32>
    %135 = arith.addf %133, %134 : vector<16x128xf32>
    %c0_50 = arith.constant 0 : index
    %c0_51 = arith.constant 0 : index
    %136 = vector.load %arg9[%c0_50, %c0_51] : memref<16x128xf32, #tpu.memory_space<vmem>>, vector<16x128xf32>
    tpu.vector_store %arg9[%c0_50, %c0_51], %135 {strides = array<i32>} : memref<16x128xf32, #tpu.memory_space<vmem>>, vector<16x128xf32>,
    return
  }
  func.func @transform_0(%arg0: i32) -> (i32, i32) {
    %c0_i32 = arith.constant 0 : i32
    %c0_i32_0 = arith.constant 0 : i32
    return %arg0, %c0_i32 : i32, i32
  }
  func.func @transform_1(%arg0: i32) -> (i32, i32) {
    %c0_i32 = arith.constant 0 : i32
    %c0_i32_0 = arith.constant 0 : i32
    return %arg0, %c0_i32 : i32, i32
  }
  func.func @transform_2(%arg0: i32) -> (i32, i32) {
    %c0_i32 = arith.constant 0 : i32
    %c0_i32_0 = arith.constant 0 : i32
    return %arg0, %c0_i32 : i32, i32
  }
  func.func @transform_3(%arg0: i32) -> (i32, i32) {
    %c0_i32 = arith.constant 0 : i32
    %c0_i32_0 = arith.constant 0 : i32
    %c0_i32_1 = arith.constant 0 : i32
    return %c0_i32, %c0_i32_0 : i32, i32
  }
  func.func @transform_4(%arg0: i32) -> (i32, i32) {
    %c0_i32 = arith.constant 0 : i32
    %c0_i32_0 = arith.constant 0 : i32
    %c0_i32_1 = arith.constant 0 : i32
    return %c0_i32, %c0_i32_0 : i32, i32
  }
  func.func @transform_5(%arg0: i32) -> (i32, i32) {
    %c0_i32 = arith.constant 0 : i32
    %c0_i32_0 = arith.constant 0 : i32
    %c0_i32_1 = arith.constant 0 : i32
    return %c0_i32, %c0_i32_0 : i32, i32
  }
  func.func @transform_6(%arg0: i32) -> (i32, i32) {
    %c0_i32 = arith.constant 0 : i32
    %c0_i32_0 = arith.constant 0 : i32
    %c0_i32_1 = arith.constant 0 : i32
    return %c0_i32, %c0_i32_0 : i32, i32
  }
  func.func @transform_7(%arg0: i32) -> (i32, i32) {
    %c0_i32 = arith.constant 0 : i32
    %c0_i32_0 = arith.constant 0 : i32
    return %arg0, %c0_i32 : i32, i32
  }
  func.func @transform_8(%arg0: i32) -> (i32, i32) {
    %c0_i32 = arith.constant 0 : i32
    %c0_i32_0 = arith.constant 0 : i32
    return %arg0, %c0_i32 : i32, i32
  }
}

</mosaic_0001>

<bundles_post_ra>
// kernel: mul.35
= control target key start
LH: loop header
LB: loop body
LE: loop exit
PB: predicated region body
PF: predicated region fallthrough
CT: control target
= control target key end

     0   :  { %vm7_vm0 = vcmask 64512   ;;  %vm13_vm1 = vcmask 130112   ;;  %s39_s0 = inlined_call_operand.vmem [shape: f32[2,8], index: 0, kind: input, shape index: {}]   ;;  %s40_s1 = inlined_call_operand.vmem [shape: f32[16], index: 1, kind: output, shape index: {}]  }
   0x1   :  { %v4_v0 = vld [vmem:[%s39_s0] sm:$0x3]  ;;  %s22_s0 = smov 8  }
   0x2   :  { %5 = vst [vmem:[#allocation1] sm:$0x3] %v4_v0 }
   0x9   :  { %v10_v1 = vld [vmem:[#allocation1 + $0x1] sm:$0x1]   ;;  %v6_v2 = vld [vmem:[#allocation1] sm:$0x1]  }
   0xa   :  { %11 = vrot.lane.b32.xlu0 %v10_v1, %s22_s0  ;;  %8 = vst.msk [vmem:[#allocation0] sm:$0x1] %vm7_vm0, %v6_v2  }
  0x7c   :  { %v12_v3 = vpop.permute.xlu0 %11  }
  0x7d   :  { %14 = vst.msk [vmem:[#allocation0] sm:$0x1] %vm13_vm1, %v12_v3  }
  0x84   :  { %v18_v4 = vld [vmem:[#allocation0] sm:$0x1] }
  0x85   :  { %20 = vst [vmem:[%s40_s1] sm:$0x1] %v18_v4 }

// kernel: model_forward.4
= control target key start
LH: loop header
LB: loop body
LE: loop exit
PB: predicated region body
PF: predicated region fallthrough
CT: control target
= control target key end

     0   :  { %v1124_v0 = vmov 0.0   ;;  %vm1125_vm0 = vmmov 0   ;;  %vm153_vm1 = vcmask 785408   ;;  %vm295_vm2 = vcmask 261120   ;;  %s1425_s4 = inlined_call_operand.vmem [shape: bf16[320,96], index: 4, kind: input, shape index: {}]   ;;  %s1426_s2 = inlined_call_operand.vmem [shape: bf16[16,96], index: 2, kind: input, shape index: {}]   ;;  %s1427_s1 = inlined_call_operand.vmem [shape: bf16[16,96], index: 1, kind: input, shape index: {}]   ;;  %s1428_s0 = inlined_call_operand.vmem [shape: f32[16,32], index: 0, kind: input, shape index: {}]   ;;  %s1429_s3 = inlined_call_operand.vmem [shape: bf16[256,32], index: 3, kind: input, shape index: {}]   ;;  %s1430_s6 = inlined_call_operand.vmem [shape: f32[16,128], index: 6, kind: input, shape index: {}]   ;;  %s1431_s5 = inlined_call_operand.vmem [shape: bf16[64,128], index: 5, kind: input, shape index: {}]   ;;  %s1432_s7 = inlined_call_operand.vmem [shape: f32[16,32], index: 7, kind: output, shape index: {}]  }
   0x1   :  { %962 = vmatprep.subr.bf16.mxu0 %v1124_v0  ;;  %978 = vmatprep.subr.bf16.mxu1 %v1124_v0  ;;  %v1072_v1 = vld [vmem:[%s1425_s4 + $0x40] sm:$0xff]   ;;  %v1073_v2 = vld [vmem:[%s1425_s4 + $0x10] sm:$0xff]   ;;  %v1074_v3 = vld [vmem:[%s1425_s4 + $0x48] sm:$0xff]   ;;  %v342_v30 = vlaneseq }
   0x2   :  { %974 = vmatprep.mubr.msk.bf16.mxu0 %vm1125_vm0, %v1124_v0  ;;  %990 = vmatprep.mubr.msk.bf16.mxu1 %vm1125_vm0, %v1124_v0  ;;  %v1075_v4 = vld [vmem:[%s1425_s4 + $0x18] sm:$0xff]   ;;  %v1076_v5 = vld [vmem:[%s1425_s4 + $0x50] sm:$0xff]   ;;  %v1077_v6 = vld [vmem:[%s1425_s4 + $0x20] sm:$0xff]  }
   0x3   :  { %963 = vmatpush3.bf16.msra.mxu0 %v1072_v1  ;;  %979 = vmatpush3.bf16.msra.mxu1 %v1073_v2  ;;  %v1078_v7 = vld [vmem:[%s1425_s4 + $0x58] sm:$0xff]   ;;  %v1079_v8 = vld [vmem:[%s1425_s4 + $0x28] sm:$0xff]   ;;  %v1080_v9 = vld [vmem:[%s1425_s4 + $0x60] sm:$0xff]   ;;  %v1295_v32 = vshrl.u32 %v342_v30, 7 }
   0x4   :  { %964 = vmatprep.subr.bf16.mxu0 %v1124_v0  ;;  %980 = vmatprep.subr.bf16.mxu1 %v1124_v0  ;;  %v1081_v10 = vld [vmem:[%s1425_s4 + $0x30] sm:$0xff]   ;;  %v1082_v11 = vld [vmem:[%s1425_s4 + $0x68] sm:$0xff]   ;;  %v1083_v12 = vld [vmem:[%s1425_s4 + $0x38] sm:$0xff]  }
   0x5   :  { %v1084_v13 = vld [vmem:[%s1426_s2] sm:$0xff]   ;;  %v1087_v16 = vld [vmem:[%s1425_s4 + $0x8] sm:$0xff]   ;;  %v1088_v20 = vld [vmem:[%s1425_s4 + $0x70] sm:$0xff]   ;;  %v344_v42 = vsub.s32 0, %v1295_v32  ;;  %v353_v58 = vsub.s32 1, %v1295_v32 }
   0x6   :  { %v1085_v14 = vld [vmem:[%s1427_s1] sm:$0xff]   ;;  %v1246_v18 = vld [vmem:[%s1428_s0 + $0x8] sm:$0xff]  ;;  %v1089_v21 = vld [vmem:[%s1425_s4 + $0x78] sm:$0xff]  }
   0x7   :  { %965 = vmatpush3.bf16.msra.mxu0 %v1074_v3  ;;  %981 = vmatpush3.bf16.msra.mxu1 %v1075_v4  ;;  %v1086_v15 = vld [vmem:[%s1425_s4] sm:$0xff]   ;;  %v1091_v23 = vld [vmem:[%s1425_s4 + $0x88] sm:$0xff]   ;;  %v1092_v24 = vld [vmem:[%s1425_s4 + $0x90] sm:$0xff]  }
   0x8   :  { %966 = vmatprep.subr.bf16.mxu0 %v1124_v0  ;;  %982 = vmatprep.subr.bf16.mxu1 %v1124_v0  ;;  %v1241_v17 = vld [vmem:[%s1428_s0] sm:$0xff]  ;;  %v1093_v25 = vld [vmem:[%s1425_s4 + $0x98] sm:$0xff]   ;;  %v1095_v27 = vld [vmem:[%s1429_s3 + $0x8] sm:$0xff]  }
   0x9   :  { %v29_v19 = vpack.c.bf16 %v1246_v18, %v1241_v17  ;;  %v1090_v22 = vld [vmem:[%s1425_s4 + $0x80] sm:$0xff]   ;;  %v1096_v28 = vld [vmem:[%s1429_s3 + $0x10] sm:$0xff]   ;;  %v1097_v29 = vld [vmem:[%s1429_s3 + $0x18] sm:$0xff]  }
   0xa   :  { %v1094_v26 = vld [vmem:[%s1429_s3] sm:$0xff]   ;;  %v1099_v57 = vld [vmem:[%s1429_s3 + $0x28] sm:$0xff]  }
   0xb   :  { %967 = vmatpush3.bf16.msra.mxu0 %v1076_v5  ;;  %983 = vmatpush3.bf16.msra.mxu1 %v1077_v6  ;;  %v1301_v43 = vld [vmem:[%s1430_s6] sm:$0xff]  ;;  %v440_v6 = vsub.s32 2, %v1295_v32 }
   0xc   :  { %968 = vmatprep.subr.bf16.mxu0 %v1124_v0  ;;  %984 = vmatprep.subr.bf16.mxu1 %v1124_v0  ;;  %v345_v44 = vrot.slane %v1301_v43, %v344_v42  ;;  %v1098_v56 = vld [vmem:[%s1429_s3 + $0x20] sm:$0xff]   ;;  %v354_v59 = vrot.slane %v1301_v43, %v353_v58 }
   0xd   :  { %v1100_v30 = vld [vmem:[%s1431_s5] sm:$0xff]  }
   0xf   :  { %969 = vmatpush3.bf16.msra.mxu0 %v1078_v7  ;;  %985 = vmatpush3.bf16.msra.mxu1 %v1079_v8  ;;  %v441_v7 = vrot.slane %v1301_v43, %v440_v6 }
  0x10   :  { %970 = vmatprep.subr.bf16.mxu0 %v1124_v0  ;;  %986 = vmatprep.subr.bf16.mxu1 %v1124_v0 }
  0x13   :  { %971 = vmatpush3.bf16.msra.mxu0 %v1080_v9  ;;  %987 = vmatpush3.bf16.msra.mxu1 %v1081_v10 }
  0x14   :  { %972 = vmatprep.subr.bf16.mxu0 %v1124_v0  ;;  %988 = vmatprep.subr.bf16.mxu1 %v1124_v0 }
  0x17   :  { %973 = vmatpush3.bf16.msra.mxu0 %v1082_v11  ;;  %989 = vmatpush3.bf16.msra.mxu1 %v1083_v12 }
  0x18   :  { %1018 = vmatprep.subr.bf16.mxu0 %v1124_v0  ;;  %994 = vmatprep.subr.bf16.mxu1 %v1124_v0 }
  0x1a   :  { %975 = vmatmul.mubr.msk.bf16.vlgmr.msra.gmra.mrb[0].mxu0 %vm153_vm1, %v1084_v13  ;;  %991 = vmatmul.mubr.msk.bf16.vlgmr.msra.gmra.mrb[0].mxu1 %vm153_vm1, %v1085_v14 }
  0x1b   :  { %1030 = vmatprep.mubr.msk.bf16.mxu0 %vm1125_vm0, %v1124_v0  ;;  %995 = vmatpush3.bf16.msra.mxu1 %v1086_v15 }
  0x1c   :  { %998 = vmatprep.mubr.msk.bf16.mxu1 %vm1125_vm0, %v1124_v0  ;;  %996 = vmatprep.subr.bf16.mxu1 %v1124_v0 }
  0x1d   :  { %1019 = vmatpush3.bf16.msra.mxu0 %v1094_v26 }
  0x1e   :  { %1020 = vmatprep.subr.bf16.mxu0 %v1124_v0 }
  0x1f   :  { %997 = vmatpush3.bf16.msra.mxu1 %v1087_v16 }
  0x20   :  { %1002 = vmatprep.subr.bf16.mxu1 %v1124_v0 }
  0x21   :  { %1021 = vmatpush3.bf16.msra.mxu0 %v1095_v27 }
  0x22   :  { %999 = vmatmul.mubr.msk.bf16.vlgmr.msra.gmra.mrb[4].mxu1 %vm295_vm2, %v29_v19  ;;  %1022 = vmatprep.subr.bf16.mxu0 %v1124_v0 }
  0x23   :  { %1003 = vmatpush3.bf16.msra.mxu1 %v1088_v20  ;;  %1014 = vmatprep.mubr.msk.bf16.mxu1 %vm1125_vm0, %v1124_v0 }
  0x24   :  { %1004 = vmatprep.subr.bf16.mxu1 %v1124_v0 }
  0x25   :  { %1023 = vmatpush3.bf16.msra.mxu0 %v1096_v28 }
  0x26   :  { %1024 = vmatprep.subr.bf16.mxu0 %v1124_v0 }
  0x27   :  { %1005 = vmatpush3.bf16.msra.mxu1 %v1089_v21 }
  0x28   :  { %1006 = vmatprep.subr.bf16.mxu1 %v1124_v0 }
  0x29   :  { %1025 = vmatpush3.bf16.msra.mxu0 %v1097_v29 }
  0x2a   :  { %1026 = vmatprep.subr.bf16.mxu0 %v1124_v0 }
  0x2b   :  { %1007 = vmatpush3.bf16.msra.mxu1 %v1090_v22 }
  0x2c   :  { %1008 = vmatprep.subr.bf16.mxu1 %v1124_v0 }
  0x2d   :  { %1027 = vmatpush3.bf16.msra.mxu0 %v1098_v56 }
  0x2e   :  { %1028 = vmatprep.subr.bf16.mxu0 %v1124_v0 }
  0x2f   :  { %1009 = vmatpush3.bf16.msra.mxu1 %v1091_v23 }
  0x30   :  { %1010 = vmatprep.subr.bf16.mxu1 %v1124_v0 }
  0x31   :  { %1029 = vmatpush3.bf16.msra.mxu0 %v1099_v57 }
  0x32   :  { %1042 = vmatprep.subr.bf16.mxu0 %v1124_v0 }
  0x33   :  { %1011 = vmatpush3.bf16.msra.mxu1 %v1092_v24 }
  0x34   :  { %1012 = vmatprep.subr.bf16.mxu1 %v1124_v0 }
  0x37   :  { %1013 = vmatpush3.bf16.msra.mxu1 %v1093_v25 }
  0x38   :  { %1034 = vmatprep.subr.bf16.mxu1 %v1124_v0 }
  0xed   :  { %v191_v31 = vpop.f32.mrb[0].mxu0  ;;  %v276_v33 = vpop.f32.mrb[0].mxu1 }
  0xee   :  { %v976_v34 = vpop.f32.mrb[1].mxu0  ;;  %v277_v35 = vadd.f32 %v276_v33, %v191_v31  ;;  %v992_v36 = vpop.f32.mrb[1].mxu1  ;;  %v1101_v31 = vld [vmem:[%s1431_s5 + $0x8] sm:$0xff]   ;;  %v1102_v33 = vld [vmem:[%s1429_s3 + $0x40] sm:$0xff]  }
  0xef   :  { %v194_v37 = vpop.f32.mrb[2].mxu0  ;;  %v279_v38 = vpop.f32.mrb[2].mxu1  ;;  %v1103_v34 = vld [vmem:[%s1429_s3 + $0x48] sm:$0xff]   ;;  %v1105_v36 = vld [vmem:[%s1429_s3 + $0x58] sm:$0xff]  }
  0xf0   :  { %v977_v39 = vpop.f32.mrb[3].mxu0  ;;  %v280_v40 = vadd.f32 %v279_v38, %v194_v37  ;;  %v993_v41 = vpop.f32.mrb[3].mxu1  ;;  %v1106_v37 = vld [vmem:[%s1429_s3 + $0x60] sm:$0xff]   ;;  %v1107_v38 = vld [vmem:[%s1429_s3 + $0x68] sm:$0xff]  }
  0xf5   :  { %v333_v45 = vpop.f32.mrb[4].mxu1 }
  0xf6   :  { %v340_v46 = vadd.f32 %v333_v45, %v277_v35  ;;  %v1000_v47 = vpop.f32.mrb[5].mxu1  ;;  %v1104_v35 = vld [vmem:[%s1429_s3 + $0x50] sm:$0xff]  }
  0xf7   :  { %v336_v48 = vpop.f32.mrb[6].mxu1  ;;  %v553_v47 = vsub.s32 3, %v1295_v32 }
  0xf8   :  { %v346_v49 = vadd.f32 %v345_v44, %v340_v46  ;;  %v341_v50 = vadd.f32 %v336_v48, %v280_v40  ;;  %v1001_v51 = vpop.f32.mrb[7].mxu1 }
  0xf9   :  { %v559_v51 = vsub.s32 4, %v1295_v32 }
  0xfa   :  { %v347_v52 = vadd.f32 %v345_v44, %v341_v50  ;;  %v348_v53 = vmax.f32 %v346_v49, 0.0  ;;  %v554_v49 = vrot.slane %v1301_v43, %v553_v47 }
  0xfc   :  { %v349_v54 = vmax.f32 %v347_v52, 0.0 }
  0xfe   :  { %v350_v55 = vpack.c.bf16 %v349_v54, %v348_v53 }
 0x100   :  { %1015 = vmatmul.mubr.msk.bf16.vlgmr.msra.gmra.mrb[8].mxu1 %vm153_vm1, %v350_v55  ;;  %v560_v55 = vrot.slane %v1301_v43, %v559_v51 }
 0x101   :  { %1038 = vmatprep.mubr.msk.bf16.mxu1 %vm1125_vm0, %v1124_v0  ;;  %1035 = vmatpush3.bf16.msra.mxu1 %v1100_v30 }
 0x102   :  { %1036 = vmatprep.subr.bf16.mxu1 %v1124_v0 }
 0x105   :  { %1037 = vmatpush3.bf16.msra.mxu1 %v1101_v31 }
 0x106   :  { %1062 = vmatprep.subr.bf16.mxu1 %v1124_v0 }
 0x1d3   :  { %v428_v60 = vpop.f32.mrb[8].mxu1 }
 0x1d4   :  { %v429_v61 = vadd.f32 %v428_v60, %v354_v59  ;;  %v1016_v62 = vpop.f32.mrb[9].mxu1 }
 0x1d5   :  { %v431_v63 = vpop.f32.mrb[10].mxu1  ;;  %v1109_v62 = vld [vmem:[%s1429_s3 + $0x78] sm:$0xff]  }
 0x1d6   :  { %v432_v1 = vadd.f32 %v431_v63, %v354_v59  ;;  %v1017_v2 = vpop.f32.mrb[11].mxu1  ;;  %v435_v3 = vmax.f32 %v429_v61, 0.0  ;;  %v1108_v61 = vld [vmem:[%s1429_s3 + $0x70] sm:$0xff]   ;;  %v566_v63 = vsub.s32 5, %v1295_v32 }
 0x1d8   :  { %v436_v4 = vmax.f32 %v432_v1, 0.0  ;;  %v567_v1 = vrot.slane %v1301_v43, %v566_v63 }
 0x1da   :  { %v437_v5 = vpack.c.bf16 %v436_v4, %v435_v3 }
 0x1dc   :  { %1031 = vmatmul.mubr.msk.bf16.vlgmr.msra.gmra.mrb[4].mxu0 %vm153_vm1, %v437_v5 }
 0x1dd   :  { %1058 = vmatprep.mubr.msk.bf16.mxu0 %vm1125_vm0, %v1124_v0  ;;  %1043 = vmatpush3.bf16.msra.mxu0 %v1102_v33 }
 0x1de   :  { %1044 = vmatprep.subr.bf16.mxu0 %v1124_v0 }
 0x1e1   :  { %1045 = vmatpush3.bf16.msra.mxu0 %v1103_v34 }
 0x1e2   :  { %1046 = vmatprep.subr.bf16.mxu0 %v1124_v0 }
 0x1e5   :  { %1047 = vmatpush3.bf16.msra.mxu0 %v1104_v35 }
 0x1e6   :  { %1048 = vmatprep.subr.bf16.mxu0 %v1124_v0 }
 0x1e9   :  { %1049 = vmatpush3.bf16.msra.mxu0 %v1105_v36 }
 0x1ea   :  { %1050 = vmatprep.subr.bf16.mxu0 %v1124_v0 }
 0x1ed   :  { %1051 = vmatpush3.bf16.msra.mxu0 %v1106_v37  ;;  %v1110_v37 = vld [vmem:[%s1429_s3 + $0x30] sm:$0xff]  }
 0x1ee   :  { %1052 = vmatprep.subr.bf16.mxu0 %v1124_v0 }
 0x1f1   :  { %1053 = vmatpush3.bf16.msra.mxu0 %v1107_v38  ;;  %v1111_v38 = vld [vmem:[%s1429_s3 + $0x38] sm:$0xff]  }
 0x1f2   :  { %1054 = vmatprep.subr.bf16.mxu0 %v1124_v0 }
 0x1f5   :  { %1055 = vmatpush3.bf16.msra.mxu0 %v1108_v61 }
 0x1f6   :  { %1056 = vmatprep.subr.bf16.mxu0 %v1124_v0 }
 0x1f9   :  { %1057 = vmatpush3.bf16.msra.mxu0 %v1109_v62 }
 0x2af   :  { %v515_v8 = vpop.f32.mrb[4].mxu0 }
 0x2b0   :  { %v516_v9 = vadd.f32 %v515_v8, %v441_v7  ;;  %v1032_v10 = vpop.f32.mrb[5].mxu0 }
 0x2b1   :  { %v518_v11 = vpop.f32.mrb[6].mxu0 }
 0x2b2   :  { %v519_v12 = vadd.f32 %v518_v11, %v441_v7  ;;  %v1033_v13 = vpop.f32.mrb[7].mxu0  ;;  %v522_v14 = vadd.f32 %v516_v9, %v1241_v17 }
 0x2b4   :  { %v524_v15 = vsel %vm295_vm2, %v522_v14, 0.0  ;;  %v523_v16 = vadd.f32 %v519_v12, %v1246_v18  ;;  %v629_v12 = vsub.s32 6, %v1295_v32 }
 0x2b5   :  { %525 = vadd.xlane.f32.xlu0 %v524_v15 }
 0x2b6   :  { %v527_v19 = vsel %vm295_vm2, %v523_v16, 0.0  ;;  %v630_v13 = vrot.slane %v1301_v43, %v629_v12 }
 0x2b9   :  { %528 = vadd.xlane.f32.xlu0 %v527_v19 }
 0x342   :  { %v526_v20 = vpop.xlane.xlu0 %525 }
 0x343   :  { %v531_v21 = vmul.f32 0.03125, %v526_v20 }
 0x345   :  { %v533_v22 = vsub.f32 %v522_v14, %v531_v21 }
 0x346   :  { %v529_v23 = vpop.xlane.xlu0 %528 }
 0x347   :  { %v532_v24 = vmul.f32 0.03125, %v529_v23  ;;  %v535_v25 = vmul.f32 %v533_v22, %v533_v22 }
 0x349   :  { %v534_v26 = vsub.f32 %v523_v16, %v532_v24  ;;  %v537_v27 = vsel %vm295_vm2, %v535_v25, 0.0 }
 0x34a   :  { %538 = vadd.xlane.f32.xlu1 %v537_v27 }
 0x34b   :  { %v536_v28 = vmul.f32 %v534_v26, %v534_v26 }
 0x34d   :  { %v540_v29 = vsel %vm295_vm2, %v536_v28, 0.0 }
 0x34e   :  { %541 = vadd.xlane.f32.xlu1 %v540_v29 }
 0x3d7   :  { %v539_v39 = vpop.xlane.xlu1 %538 }
 0x3d8   :  { %v543_v40 = vmul.f32 0.03125, %v539_v39 }
 0x3da   :  { %v545_v41 = vadd.f32 1e-05, %v543_v40 }
 0x3db   :  { %v542_v44 = vpop.xlane.xlu1 %541 }
 0x3dc   :  { %1112 = vrsqrt.f32 %v545_v41  ;;  %v544_v45 = vmul.f32 0.03125, %v542_v44 }
 0x3de   :  { %v546_v46 = vadd.f32 1e-05, %v544_v45 }
 0x3e0   :  { %1114 = vrsqrt.f32 %v546_v46 }
 0x3e6   :  { %v1113_v48 = vpop.eup %1112 }
 0x3e7   :  { %v549_v50 = vmul.f32 %v1113_v48, %v533_v22  ;;  %v750_v48 = vsub.s32 7, %v1295_v32 }
 0x3e9   :  { %v555_v53 = vmul.f32 %v554_v49, %v549_v50 }
 0x3ea   :  { %v1115_v52 = vpop.eup %1114 }
 0x3eb   :  { %v550_v54 = vmul.f32 %v1115_v52, %v534_v26  ;;  %v561_v57 = vadd.f32 %v560_v55, %v555_v53 }
 0x3ed   :  { %v556_v56 = vmul.f32 %v554_v49, %v550_v54  ;;  %v751_v49 = vrot.slane %v1301_v43, %v750_v48 }
 0x3ef   :  { %v562_v59 = vadd.f32 %v560_v55, %v556_v56 }
 0x3f1   :  { %v563_v60 = vpack.c.bf16 %v562_v59, %v561_v57 }
 0x3f3   :  { %1039 = vmatmul.mubr.msk.bf16.vlgmr.msra.gmra.mrb[12].mxu1 %vm295_vm2, %v563_v60 }
 0x3f4   :  { %1066 = vmatprep.mubr.msk.bf16.mxu1 %vm1125_vm0, %v1124_v0  ;;  %1063 = vmatpush3.bf16.msra.mxu1 %v1110_v37 }
 0x3f5   :  { %1064 = vmatprep.subr.bf16.mxu1 %v1124_v0  ;;  %v107_v0 = vld [vmem:[%s1430_s6 + $0x8] sm:$0xff] }
 0x3f6   :  { %v757_v53 = vrot.slane %v107_v0, %v344_v42  ;;  %v764_v43 = vrot.slane %v107_v0, %v353_v58 }
 0x3f8   :  { %1065 = vmatpush3.bf16.msra.mxu1 %v1111_v38 }
 0x4c6   :  { %v617_v2 = vpop.f32.mrb[12].mxu1 }
 0x4c7   :  { %v618_v3 = vadd.f32 %v617_v2, %v567_v1  ;;  %v1040_v4 = vpop.f32.mrb[13].mxu1 }
 0x4c8   :  { %v620_v5 = vpop.f32.mrb[14].mxu1 }
 0x4c9   :  { %v621_v7 = vadd.f32 %v620_v5, %v567_v1  ;;  %v1041_v8 = vpop.f32.mrb[15].mxu1  ;;  %v624_v9 = vmax.f32 %v618_v3, 0.0 }
 0x4cb   :  { %v625_v10 = vmax.f32 %v621_v7, 0.0 }
 0x4cd   :  { %v626_v11 = vpack.c.bf16 %v625_v10, %v624_v9 }
 0x4cf   :  { %1059 = vmatmul.mubr.bf16.vlgmr.msra.gmra.mrb[8].mxu0 %v626_v11 }
 0x5a2   :  { %v713_v14 = vpop.f32.mrb[8].mxu0 }
 0x5a3   :  { %v714_v15 = vadd.f32 %v713_v14, %v630_v13  ;;  %v1060_v16 = vpop.f32.mrb[9].mxu0 }
 0x5a4   :  { %v716_v19 = vpop.f32.mrb[10].mxu0 }
 0x5a5   :  { %v717_v20 = vadd.f32 %v716_v19, %v630_v13  ;;  %v1061_v21 = vpop.f32.mrb[11].mxu0  ;;  %v720_v22 = vadd.f32 %v714_v15, %v561_v57 }
 0x5a7   :  { %v722_v23 = vsel %vm295_vm2, %v720_v22, 0.0  ;;  %v721_v24 = vadd.f32 %v717_v20, %v562_v59 }
 0x5a8   :  { %723 = vadd.xlane.f32.xlu0 %v722_v23 }
 0x5a9   :  { %v725_v25 = vsel %vm295_vm2, %v721_v24, 0.0 }
 0x5aa   :  { %726 = vadd.xlane.f32.xlu1 %v725_v25  ;;  %v852_v25 = vrot.slane %v107_v0, %v440_v6 }
 0x635   :  { %v724_v26 = vpop.xlane.xlu0 %723 }
 0x636   :  { %v728_v27 = vmul.f32 0.03125, %v724_v26 }
 0x637   :  { %v727_v28 = vpop.xlane.xlu1 %726 }
 0x638   :  { %v730_v29 = vsub.f32 %v720_v22, %v728_v27  ;;  %v729_v30 = vmul.f32 0.03125, %v727_v28  ;;  %v858_v27 = vrot.slane %v107_v0, %v553_v47 }
 0x63a   :  { %v731_v31 = vsub.f32 %v721_v24, %v729_v30  ;;  %v732_v33 = vmul.f32 %v730_v29, %v730_v29 }
 0x63c   :  { %v734_v34 = vsel %vm295_vm2, %v732_v33, 0.0  ;;  %v733_v35 = vmul.f32 %v731_v31, %v731_v31 }
 0x63d   :  { %735 = vadd.xlane.f32.xlu0 %v734_v34 }
 0x63e   :  { %v737_v36 = vsel %vm295_vm2, %v733_v35, 0.0 }
 0x63f   :  { %738 = vadd.xlane.f32.xlu1 %v737_v36 }
 0x6ca   :  { %v736_v39 = vpop.xlane.xlu0 %735 }
 0x6cb   :  { %v740_v40 = vmul.f32 0.03125, %v736_v39 }
 0x6cc   :  { %v739_v41 = vpop.xlane.xlu1 %738 }
 0x6cd   :  { %v742_v44 = vadd.f32 1e-05, %v740_v40  ;;  %v741_v45 = vmul.f32 0.03125, %v739_v41 }
 0x6cf   :  { %1116 = vrsqrt.f32 %v742_v44  ;;  %v743_v46 = vadd.f32 1e-05, %v741_v45 }
 0x6d1   :  { %1118 = vrsqrt.f32 %v743_v46 }
 0x6d9   :  { %v1117_v50 = vpop.eup %1116 }
 0x6da   :  { %v746_v51 = vmul.f32 %v1117_v50, %v730_v29 }
 0x6db   :  { %v1119_v52 = vpop.eup %1118 }
 0x6dc   :  { %v752_v54 = vmul.f32 %v751_v49, %v746_v51  ;;  %v747_v55 = vmul.f32 %v1119_v52, %v731_v31 }
 0x6de   :  { %v753_v56 = vmul.f32 %v751_v49, %v747_v55  ;;  %v758_v57 = vadd.f32 %v757_v53, %v752_v54 }
 0x6e0   :  { %v759_v59 = vadd.f32 %v757_v53, %v753_v56 }
 0x6e2   :  { %v760_v60 = vpack.c.bf16 %v759_v59, %v758_v57 }
 0x6e4   :  { %1067 = vmatmul.mubr.msk.bf16.vlgmr.msra.gmra.mrb[16].mxu1 %vm295_vm2, %v760_v60 }
 0x7b7   :  { %v814_v61 = vpop.f32.mrb[16].mxu1 }
 0x7b8   :  { %v815_v62 = vadd.f32 %v814_v61, %v764_v43  ;;  %v1068_v63 = vpop.f32.mrb[17].mxu1 }
 0x7b9   :  { %v817_v1 = vpop.f32.mrb[18].mxu1 }
 0x7ba   :  { %v821_v2 = vmax.f32 %v815_v62, 0.0  ;;  %v818_v3 = vadd.f32 %v817_v1, %v764_v43  ;;  %v1069_v4 = vpop.f32.mrb[19].mxu1 }
 0x7bc   :  { %v822_v5 = vmax.f32 %v818_v3, 0.0  ;;  %v823_v42 = vsel %vm295_vm2, %v821_v2, 0.0 }
 0x7bd   :  { %824 = vadd.xlane.f32.xlu0 %v823_v42 }
 0x7be   :  { %v826_v7 = vsel %vm295_vm2, %v822_v5, 0.0 }
 0x7bf   :  { %827 = vadd.xlane.f32.xlu1 %v826_v7 }
 0x84a   :  { %v825_v8 = vpop.xlane.xlu0 %824 }
 0x84b   :  { %v829_v9 = vmul.f32 0.03125, %v825_v8 }
 0x84c   :  { %v828_v10 = vpop.xlane.xlu1 %827 }
 0x84d   :  { %v831_v11 = vsub.f32 %v821_v2, %v829_v9  ;;  %v830_v12 = vmul.f32 0.03125, %v828_v10 }
 0x84f   :  { %v832_v58 = vsub.f32 %v822_v5, %v830_v12  ;;  %v833_v13 = vmul.f32 %v831_v11, %v831_v11 }
 0x851   :  { %v835_v14 = vsel %vm295_vm2, %v833_v13, 0.0  ;;  %v834_v15 = vmul.f32 %v832_v58, %v832_v58 }
 0x852   :  { %836 = vadd.xlane.f32.xlu0 %v835_v14 }
 0x853   :  { %v838_v16 = vsel %vm295_vm2, %v834_v15, 0.0 }
 0x854   :  { %839 = vadd.xlane.f32.xlu1 %v838_v16 }
 0x8df   :  { %v837_v19 = vpop.xlane.xlu0 %836 }
 0x8e0   :  { %v841_v20 = vmul.f32 0.03125, %v837_v19 }
 0x8e1   :  { %v840_v21 = vpop.xlane.xlu1 %839 }
 0x8e2   :  { %v843_v22 = vadd.f32 1e-05, %v841_v20  ;;  %v842_v23 = vmul.f32 0.03125, %v840_v21 }
 0x8e4   :  { %1120 = vrsqrt.f32 %v843_v22  ;;  %v844_v24 = vadd.f32 1e-05, %v842_v23 }
 0x8e6   :  { %1122 = vrsqrt.f32 %v844_v24 }
 0x8ee   :  { %v1121_v26 = vpop.eup %1120 }
 0x8ef   :  { %v847_v28 = vmul.f32 %v1121_v26, %v831_v11 }
 0x8f0   :  { %v1123_v29 = vpop.eup %1122 }
 0x8f1   :  { %v853_v30 = vmul.f32 %v852_v25, %v847_v28  ;;  %v848_v31 = vmul.f32 %v1123_v29, %v832_v58 }
 0x8f3   :  { %v859_v33 = vadd.f32 %v858_v27, %v853_v30  ;;  %v854_v34 = vmul.f32 %v852_v25, %v848_v31 }
 0x8f5   :  { %v861_v35 = vadd.f32 %v859_v33, %v1241_v17  ;;  %v860_v36 = vadd.f32 %v858_v27, %v854_v34 }
 0x8f7   :  { %863 = vst.msk [vmem:[%s1432_s7] sm:$0xff] %vm295_vm2, %v861_v35  ;;  %v862_v6 = vadd.f32 %v860_v36, %v1246_v18 }
 0x8f9   :  { %864 = vst.msk [vmem:[%s1432_s7 + $0x8] sm:$0xff] %vm295_vm2, %v862_v6 }

// kernel: model_forward.7
= control target key start
LH: loop header
LB: loop body
LE: loop exit
PB: predicated region body
PF: predicated region fallthrough
CT: control target
= control target key end

     0   :  { %v1213_v0 = vmov 0.0   ;;  %vm1214_vm0 = vmmov 0   ;;  %vm155_vm1 = vcmask 785408   ;;  %vm297_vm2 = vcmask 261120   ;;  %s1547_s4 = inlined_call_operand.vmem [shape: bf16[320,96], index: 4, kind: input, shape index: {}]   ;;  %s1548_s2 = inlined_call_operand.vmem [shape: bf16[16,96], index: 2, kind: input, shape index: {}]   ;;  %s1549_s1 = inlined_call_operand.vmem [shape: bf16[16,96], index: 1, kind: input, shape index: {}]   ;;  %s1550_s0 = inlined_call_operand.vmem [shape: f32[16,32], index: 0, kind: input, shape index: {}]   ;;  %s1551_s3 = inlined_call_operand.vmem [shape: bf16[256,32], index: 3, kind: input, shape index: {}]   ;;  %s1552_s6 = inlined_call_operand.vmem [shape: f32[16,128], index: 6, kind: input, shape index: {}]   ;;  %s1553_s5 = inlined_call_operand.vmem [shape: bf16[64,128], index: 5, kind: input, shape index: {}]   ;;  %s1554_s7 = inlined_call_operand.vmem [shape: f32[16,32], index: 7, kind: output, shape index: {0}]   ;;  %s1555_s8 = inlined_call_operand.vmem [shape: f32[16,128], index: 8, kind: output, shape index: {1}]  }
   0x1   :  { %1041 = vmatprep.subr.bf16.mxu0 %v1213_v0  ;;  %1057 = vmatprep.subr.bf16.mxu1 %v1213_v0  ;;  %v1159_v1 = vld [vmem:[%s1547_s4 + $0x40] sm:$0xff]   ;;  %v1160_v2 = vld [vmem:[%s1547_s4 + $0x10] sm:$0xff]   ;;  %v1161_v3 = vld [vmem:[%s1547_s4 + $0x48] sm:$0xff]   ;;  %v344_v30 = vlaneseq }
   0x2   :  { %1053 = vmatprep.mubr.msk.bf16.mxu0 %vm1214_vm0, %v1213_v0  ;;  %1069 = vmatprep.mubr.msk.bf16.mxu1 %vm1214_vm0, %v1213_v0  ;;  %v1162_v4 = vld [vmem:[%s1547_s4 + $0x18] sm:$0xff]   ;;  %v1163_v5 = vld [vmem:[%s1547_s4 + $0x50] sm:$0xff]   ;;  %v1164_v6 = vld [vmem:[%s1547_s4 + $0x20] sm:$0xff]  }
   0x3   :  { %1042 = vmatpush3.bf16.msra.mxu0 %v1159_v1  ;;  %1058 = vmatpush3.bf16.msra.mxu1 %v1160_v2  ;;  %v1165_v7 = vld [vmem:[%s1547_s4 + $0x58] sm:$0xff]   ;;  %v1166_v8 = vld [vmem:[%s1547_s4 + $0x28] sm:$0xff]   ;;  %v1167_v9 = vld [vmem:[%s1547_s4 + $0x60] sm:$0xff]   ;;  %v1389_v32 = vshrl.u32 %v344_v30, 7 }
   0x4   :  { %1043 = vmatprep.subr.bf16.mxu0 %v1213_v0  ;;  %1059 = vmatprep.subr.bf16.mxu1 %v1213_v0  ;;  %v1168_v10 = vld [vmem:[%s1547_s4 + $0x30] sm:$0xff]   ;;  %v1169_v11 = vld [vmem:[%s1547_s4 + $0x68] sm:$0xff]   ;;  %v1170_v12 = vld [vmem:[%s1547_s4 + $0x38] sm:$0xff]  }
   0x5   :  { %v1171_v13 = vld [vmem:[%s1548_s2] sm:$0xff]   ;;  %v1174_v16 = vld [vmem:[%s1547_s4 + $0x8] sm:$0xff]   ;;  %v1175_v20 = vld [vmem:[%s1547_s4 + $0x70] sm:$0xff]   ;;  %v346_v42 = vsub.s32 0, %v1389_v32  ;;  %v355_v58 = vsub.s32 1, %v1389_v32 }
   0x6   :  { %v1172_v14 = vld [vmem:[%s1549_s1] sm:$0xff]   ;;  %v1340_v18 = vld [vmem:[%s1550_s0 + $0x8] sm:$0xff]  ;;  %v1176_v21 = vld [vmem:[%s1547_s4 + $0x78] sm:$0xff]  }
   0x7   :  { %1044 = vmatpush3.bf16.msra.mxu0 %v1161_v3  ;;  %1060 = vmatpush3.bf16.msra.mxu1 %v1162_v4  ;;  %v1173_v15 = vld [vmem:[%s1547_s4] sm:$0xff]   ;;  %v1178_v23 = vld [vmem:[%s1547_s4 + $0x88] sm:$0xff]   ;;  %v1179_v24 = vld [vmem:[%s1547_s4 + $0x90] sm:$0xff]  }
   0x8   :  { %1045 = vmatprep.subr.bf16.mxu0 %v1213_v0  ;;  %1061 = vmatprep.subr.bf16.mxu1 %v1213_v0  ;;  %v1335_v17 = vld [vmem:[%s1550_s0] sm:$0xff]  ;;  %v1180_v25 = vld [vmem:[%s1547_s4 + $0x98] sm:$0xff]   ;;  %v1182_v27 = vld [vmem:[%s1551_s3 + $0x8] sm:$0xff]  }
   0x9   :  { %v31_v19 = vpack.c.bf16 %v1340_v18, %v1335_v17  ;;  %v1177_v22 = vld [vmem:[%s1547_s4 + $0x80] sm:$0xff]   ;;  %v1183_v28 = vld [vmem:[%s1551_s3 + $0x10] sm:$0xff]   ;;  %v1184_v29 = vld [vmem:[%s1551_s3 + $0x18] sm:$0xff]  }
   0xa   :  { %v1181_v26 = vld [vmem:[%s1551_s3] sm:$0xff]   ;;  %v1186_v57 = vld [vmem:[%s1551_s3 + $0x28] sm:$0xff]  }
   0xb   :  { %1046 = vmatpush3.bf16.msra.mxu0 %v1163_v5  ;;  %1062 = vmatpush3.bf16.msra.mxu1 %v1164_v6  ;;  %v1395_v43 = vld [vmem:[%s1552_s6] sm:$0xff]  ;;  %v442_v6 = vsub.s32 2, %v1389_v32 }
   0xc   :  { %1047 = vmatprep.subr.bf16.mxu0 %v1213_v0  ;;  %1063 = vmatprep.subr.bf16.mxu1 %v1213_v0  ;;  %v347_v44 = vrot.slane %v1395_v43, %v346_v42  ;;  %v1185_v56 = vld [vmem:[%s1551_s3 + $0x20] sm:$0xff]   ;;  %v356_v59 = vrot.slane %v1395_v43, %v355_v58 }
   0xd   :  { %v1187_v30 = vld [vmem:[%s1553_s5] sm:$0xff]  }
   0xf   :  { %1048 = vmatpush3.bf16.msra.mxu0 %v1165_v7  ;;  %1064 = vmatpush3.bf16.msra.mxu1 %v1166_v8  ;;  %v443_v7 = vrot.slane %v1395_v43, %v442_v6 }
  0x10   :  { %1049 = vmatprep.subr.bf16.mxu0 %v1213_v0  ;;  %1065 = vmatprep.subr.bf16.mxu1 %v1213_v0 }
  0x13   :  { %1050 = vmatpush3.bf16.msra.mxu0 %v1167_v9  ;;  %1066 = vmatpush3.bf16.msra.mxu1 %v1168_v10 }
  0x14   :  { %1051 = vmatprep.subr.bf16.mxu0 %v1213_v0  ;;  %1067 = vmatprep.subr.bf16.mxu1 %v1213_v0 }
  0x17   :  { %1052 = vmatpush3.bf16.msra.mxu0 %v1169_v11  ;;  %1068 = vmatpush3.bf16.msra.mxu1 %v1170_v12 }
  0x18   :  { %1097 = vmatprep.subr.bf16.mxu0 %v1213_v0  ;;  %1073 = vmatprep.subr.bf16.mxu1 %v1213_v0 }
  0x1a   :  { %1054 = vmatmul.mubr.msk.bf16.vlgmr.msra.gmra.mrb[0].mxu0 %vm155_vm1, %v1171_v13  ;;  %1070 = vmatmul.mubr.msk.bf16.vlgmr.msra.gmra.mrb[0].mxu1 %vm155_vm1, %v1172_v14 }
  0x1b   :  { %1109 = vmatprep.mubr.msk.bf16.mxu0 %vm1214_vm0, %v1213_v0  ;;  %1074 = vmatpush3.bf16.msra.mxu1 %v1173_v15 }
  0x1c   :  { %1077 = vmatprep.mubr.msk.bf16.mxu1 %vm1214_vm0, %v1213_v0  ;;  %1075 = vmatprep.subr.bf16.mxu1 %v1213_v0 }
  0x1d   :  { %1098 = vmatpush3.bf16.msra.mxu0 %v1181_v26 }
  0x1e   :  { %1099 = vmatprep.subr.bf16.mxu0 %v1213_v0 }
  0x1f   :  { %1076 = vmatpush3.bf16.msra.mxu1 %v1174_v16 }
  0x20   :  { %1081 = vmatprep.subr.bf16.mxu1 %v1213_v0 }
  0x21   :  { %1100 = vmatpush3.bf16.msra.mxu0 %v1182_v27 }
  0x22   :  { %1078 = vmatmul.mubr.msk.bf16.vlgmr.msra.gmra.mrb[4].mxu1 %vm297_vm2, %v31_v19  ;;  %1101 = vmatprep.subr.bf16.mxu0 %v1213_v0 }
  0x23   :  { %1082 = vmatpush3.bf16.msra.mxu1 %v1175_v20  ;;  %1093 = vmatprep.mubr.msk.bf16.mxu1 %vm1214_vm0, %v1213_v0 }
  0x24   :  { %1083 = vmatprep.subr.bf16.mxu1 %v1213_v0 }
  0x25   :  { %1102 = vmatpush3.bf16.msra.mxu0 %v1183_v28 }
  0x26   :  { %1103 = vmatprep.subr.bf16.mxu0 %v1213_v0 }
  0x27   :  { %1084 = vmatpush3.bf16.msra.mxu1 %v1176_v21 }
  0x28   :  { %1085 = vmatprep.subr.bf16.mxu1 %v1213_v0 }
  0x29   :  { %1104 = vmatpush3.bf16.msra.mxu0 %v1184_v29 }
  0x2a   :  { %1105 = vmatprep.subr.bf16.mxu0 %v1213_v0 }
  0x2b   :  { %1086 = vmatpush3.bf16.msra.mxu1 %v1177_v22 }
  0x2c   :  { %1087 = vmatprep.subr.bf16.mxu1 %v1213_v0 }
  0x2d   :  { %1106 = vmatpush3.bf16.msra.mxu0 %v1185_v56 }
  0x2e   :  { %1107 = vmatprep.subr.bf16.mxu0 %v1213_v0 }
  0x2f   :  { %1088 = vmatpush3.bf16.msra.mxu1 %v1178_v23 }
  0x30   :  { %1089 = vmatprep.subr.bf16.mxu1 %v1213_v0 }
  0x31   :  { %1108 = vmatpush3.bf16.msra.mxu0 %v1186_v57 }
  0x32   :  { %1121 = vmatprep.subr.bf16.mxu0 %v1213_v0 }
  0x33   :  { %1090 = vmatpush3.bf16.msra.mxu1 %v1179_v24 }
  0x34   :  { %1091 = vmatprep.subr.bf16.mxu1 %v1213_v0 }
  0x37   :  { %1092 = vmatpush3.bf16.msra.mxu1 %v1180_v25 }
  0x38   :  { %1113 = vmatprep.subr.bf16.mxu1 %v1213_v0 }
  0xed   :  { %v193_v31 = vpop.f32.mrb[0].mxu0  ;;  %v278_v33 = vpop.f32.mrb[0].mxu1 }
  0xee   :  { %v1055_v34 = vpop.f32.mrb[1].mxu0  ;;  %v279_v35 = vadd.f32 %v278_v33, %v193_v31  ;;  %v1071_v36 = vpop.f32.mrb[1].mxu1  ;;  %v1188_v31 = vld [vmem:[%s1553_s5 + $0x8] sm:$0xff]   ;;  %v1189_v33 = vld [vmem:[%s1551_s3 + $0x40] sm:$0xff]  }
  0xef   :  { %v196_v37 = vpop.f32.mrb[2].mxu0  ;;  %v281_v38 = vpop.f32.mrb[2].mxu1  ;;  %v1190_v34 = vld [vmem:[%s1551_s3 + $0x48] sm:$0xff]   ;;  %v1192_v36 = vld [vmem:[%s1551_s3 + $0x58] sm:$0xff]  }
  0xf0   :  { %v1056_v39 = vpop.f32.mrb[3].mxu0  ;;  %v282_v40 = vadd.f32 %v281_v38, %v196_v37  ;;  %v1072_v41 = vpop.f32.mrb[3].mxu1  ;;  %v1193_v37 = vld [vmem:[%s1551_s3 + $0x60] sm:$0xff]   ;;  %v1194_v38 = vld [vmem:[%s1551_s3 + $0x68] sm:$0xff]  }
  0xf5   :  { %v335_v45 = vpop.f32.mrb[4].mxu1 }
  0xf6   :  { %v342_v46 = vadd.f32 %v335_v45, %v279_v35  ;;  %v1079_v47 = vpop.f32.mrb[5].mxu1  ;;  %v1191_v35 = vld [vmem:[%s1551_s3 + $0x50] sm:$0xff]  }
  0xf7   :  { %v338_v48 = vpop.f32.mrb[6].mxu1  ;;  %v555_v47 = vsub.s32 3, %v1389_v32 }
  0xf8   :  { %v348_v49 = vadd.f32 %v347_v44, %v342_v46  ;;  %v343_v50 = vadd.f32 %v338_v48, %v282_v40  ;;  %v1080_v51 = vpop.f32.mrb[7].mxu1 }
  0xf9   :  { %v561_v51 = vsub.s32 4, %v1389_v32 }
  0xfa   :  { %v349_v52 = vadd.f32 %v347_v44, %v343_v50  ;;  %v350_v53 = vmax.f32 %v348_v49, 0.0  ;;  %v556_v49 = vrot.slane %v1395_v43, %v555_v47 }
  0xfc   :  { %v351_v54 = vmax.f32 %v349_v52, 0.0 }
  0xfe   :  { %v352_v55 = vpack.c.bf16 %v351_v54, %v350_v53 }
 0x100   :  { %1094 = vmatmul.mubr.msk.bf16.vlgmr.msra.gmra.mrb[8].mxu1 %vm155_vm1, %v352_v55  ;;  %v562_v55 = vrot.slane %v1395_v43, %v561_v51 }
 0x101   :  { %1117 = vmatprep.mubr.msk.bf16.mxu1 %vm1214_vm0, %v1213_v0  ;;  %1114 = vmatpush3.bf16.msra.mxu1 %v1187_v30 }
 0x102   :  { %1115 = vmatprep.subr.bf16.mxu1 %v1213_v0 }
 0x105   :  { %1116 = vmatpush3.bf16.msra.mxu1 %v1188_v31 }
 0x106   :  { %1141 = vmatprep.subr.bf16.mxu1 %v1213_v0 }
 0x1d3   :  { %v430_v60 = vpop.f32.mrb[8].mxu1 }
 0x1d4   :  { %v431_v61 = vadd.f32 %v430_v60, %v356_v59  ;;  %v1095_v62 = vpop.f32.mrb[9].mxu1 }
 0x1d5   :  { %v433_v63 = vpop.f32.mrb[10].mxu1  ;;  %v1196_v62 = vld [vmem:[%s1551_s3 + $0x78] sm:$0xff]  }
 0x1d6   :  { %v434_v1 = vadd.f32 %v433_v63, %v356_v59  ;;  %v1096_v2 = vpop.f32.mrb[11].mxu1  ;;  %v437_v3 = vmax.f32 %v431_v61, 0.0  ;;  %v1195_v61 = vld [vmem:[%s1551_s3 + $0x70] sm:$0xff]   ;;  %v568_v63 = vsub.s32 5, %v1389_v32 }
 0x1d8   :  { %v438_v4 = vmax.f32 %v434_v1, 0.0  ;;  %v569_v1 = vrot.slane %v1395_v43, %v568_v63 }
 0x1da   :  { %v439_v5 = vpack.c.bf16 %v438_v4, %v437_v3 }
 0x1dc   :  { %1110 = vmatmul.mubr.msk.bf16.vlgmr.msra.gmra.mrb[4].mxu0 %vm155_vm1, %v439_v5 }
 0x1dd   :  { %1137 = vmatprep.mubr.msk.bf16.mxu0 %vm1214_vm0, %v1213_v0  ;;  %1122 = vmatpush3.bf16.msra.mxu0 %v1189_v33 }
 0x1de   :  { %1123 = vmatprep.subr.bf16.mxu0 %v1213_v0 }
 0x1e1   :  { %1124 = vmatpush3.bf16.msra.mxu0 %v1190_v34 }
 0x1e2   :  { %1125 = vmatprep.subr.bf16.mxu0 %v1213_v0 }
 0x1e5   :  { %1126 = vmatpush3.bf16.msra.mxu0 %v1191_v35 }
 0x1e6   :  { %1127 = vmatprep.subr.bf16.mxu0 %v1213_v0 }
 0x1e9   :  { %1128 = vmatpush3.bf16.msra.mxu0 %v1192_v36 }
 0x1ea   :  { %1129 = vmatprep.subr.bf16.mxu0 %v1213_v0 }
 0x1ed   :  { %1130 = vmatpush3.bf16.msra.mxu0 %v1193_v37  ;;  %v1197_v37 = vld [vmem:[%s1551_s3 + $0x30] sm:$0xff]  }
 0x1ee   :  { %1131 = vmatprep.subr.bf16.mxu0 %v1213_v0 }
 0x1f1   :  { %1132 = vmatpush3.bf16.msra.mxu0 %v1194_v38  ;;  %v1198_v38 = vld [vmem:[%s1551_s3 + $0x38] sm:$0xff]  }
 0x1f2   :  { %1133 = vmatprep.subr.bf16.mxu0 %v1213_v0 }
 0x1f5   :  { %1134 = vmatpush3.bf16.msra.mxu0 %v1195_v61 }
 0x1f6   :  { %1135 = vmatprep.subr.bf16.mxu0 %v1213_v0 }
 0x1f9   :  { %1136 = vmatpush3.bf16.msra.mxu0 %v1196_v62 }
 0x2af   :  { %v517_v8 = vpop.f32.mrb[4].mxu0 }
 0x2b0   :  { %v518_v9 = vadd.f32 %v517_v8, %v443_v7  ;;  %v1111_v10 = vpop.f32.mrb[5].mxu0 }
 0x2b1   :  { %v520_v11 = vpop.f32.mrb[6].mxu0 }
 0x2b2   :  { %v521_v12 = vadd.f32 %v520_v11, %v443_v7  ;;  %v1112_v13 = vpop.f32.mrb[7].mxu0  ;;  %v524_v14 = vadd.f32 %v518_v9, %v1335_v17 }
 0x2b4   :  { %v526_v15 = vsel %vm297_vm2, %v524_v14, 0.0  ;;  %v525_v16 = vadd.f32 %v521_v12, %v1340_v18  ;;  %v631_v12 = vsub.s32 6, %v1389_v32 }
 0x2b5   :  { %527 = vadd.xlane.f32.xlu0 %v526_v15 }
 0x2b6   :  { %v529_v19 = vsel %vm297_vm2, %v525_v16, 0.0  ;;  %v632_v13 = vrot.slane %v1395_v43, %v631_v12 }
 0x2b9   :  { %530 = vadd.xlane.f32.xlu0 %v529_v19 }
 0x342   :  { %v528_v20 = vpop.xlane.xlu0 %527 }
 0x343   :  { %v533_v21 = vmul.f32 0.03125, %v528_v20 }
 0x345   :  { %v535_v22 = vsub.f32 %v524_v14, %v533_v21 }
 0x346   :  { %v531_v23 = vpop.xlane.xlu0 %530 }
 0x347   :  { %v534_v24 = vmul.f32 0.03125, %v531_v23  ;;  %v537_v25 = vmul.f32 %v535_v22, %v535_v22 }
 0x349   :  { %v536_v26 = vsub.f32 %v525_v16, %v534_v24  ;;  %v539_v27 = vsel %vm297_vm2, %v537_v25, 0.0 }
 0x34a   :  { %540 = vadd.xlane.f32.xlu1 %v539_v27 }
 0x34b   :  { %v538_v28 = vmul.f32 %v536_v26, %v536_v26 }
 0x34d   :  { %v542_v29 = vsel %vm297_vm2, %v538_v28, 0.0 }
 0x34e   :  { %543 = vadd.xlane.f32.xlu1 %v542_v29 }
 0x3d7   :  { %v541_v39 = vpop.xlane.xlu1 %540 }
 0x3d8   :  { %v545_v40 = vmul.f32 0.03125, %v541_v39 }
 0x3da   :  { %v547_v41 = vadd.f32 1e-05, %v545_v40 }
 0x3db   :  { %v544_v44 = vpop.xlane.xlu1 %543 }
 0x3dc   :  { %1201 = vrsqrt.f32 %v547_v41  ;;  %v546_v45 = vmul.f32 0.03125, %v544_v44 }
 0x3de   :  { %v548_v46 = vadd.f32 1e-05, %v546_v45 }
 0x3e0   :  { %1203 = vrsqrt.f32 %v548_v46 }
 0x3e6   :  { %v1202_v48 = vpop.eup %1201 }
 0x3e7   :  { %v551_v50 = vmul.f32 %v1202_v48, %v535_v22  ;;  %v752_v48 = vsub.s32 7, %v1389_v32 }
 0x3e9   :  { %v557_v53 = vmul.f32 %v556_v49, %v551_v50 }
 0x3ea   :  { %v1204_v52 = vpop.eup %1203 }
 0x3eb   :  { %v552_v54 = vmul.f32 %v1204_v52, %v536_v26  ;;  %v563_v57 = vadd.f32 %v562_v55, %v557_v53  ;;  %v1499_v52 = vld [vmem:[%s1552_s6 + $0x8] sm:$0xff] }
 0x3ed   :  { %v558_v56 = vmul.f32 %v556_v49, %v552_v54  ;;  %v753_v49 = vrot.slane %v1395_v43, %v752_v48  ;;  %v766_v43 = vrot.slane %v1499_v52, %v355_v58 }
 0x3ef   :  { %v564_v59 = vadd.f32 %v562_v55, %v558_v56  ;;  %v759_v55 = vrot.slane %v1499_v52, %v346_v42 }
 0x3f1   :  { %v565_v60 = vpack.c.bf16 %v564_v59, %v563_v57 }
 0x3f3   :  { %1118 = vmatmul.mubr.msk.bf16.vlgmr.msra.gmra.mrb[12].mxu1 %vm297_vm2, %v565_v60 }
 0x3f4   :  { %1145 = vmatprep.mubr.msk.bf16.mxu1 %vm1214_vm0, %v1213_v0  ;;  %1142 = vmatpush3.bf16.msra.mxu1 %v1197_v37 }
 0x3f5   :  { %1143 = vmatprep.subr.bf16.mxu1 %v1213_v0 }
 0x3f8   :  { %1144 = vmatpush3.bf16.msra.mxu1 %v1198_v38 }
 0x3f9   :  { %1149 = vmatprep.subr.bf16.mxu1 %v1213_v0 }
 0x4c6   :  { %v619_v2 = vpop.f32.mrb[12].mxu1 }
 0x4c7   :  { %v620_v3 = vadd.f32 %v619_v2, %v569_v1  ;;  %v1119_v4 = vpop.f32.mrb[13].mxu1 }
 0x4c8   :  { %v622_v5 = vpop.f32.mrb[14].mxu1 }
 0x4c9   :  { %v623_v7 = vadd.f32 %v622_v5, %v569_v1  ;;  %v1120_v8 = vpop.f32.mrb[15].mxu1  ;;  %v626_v9 = vmax.f32 %v620_v3, 0.0 }
 0x4cb   :  { %v627_v10 = vmax.f32 %v623_v7, 0.0 }
 0x4cd   :  { %v628_v11 = vpack.c.bf16 %v627_v10, %v626_v9 }
 0x4cf   :  { %1138 = vmatmul.mubr.bf16.vlgmr.msra.gmra.mrb[8].mxu0 %v628_v11 }
 0x5a2   :  { %v715_v14 = vpop.f32.mrb[8].mxu0 }
 0x5a3   :  { %v716_v15 = vadd.f32 %v715_v14, %v632_v13  ;;  %v1139_v16 = vpop.f32.mrb[9].mxu0 }
 0x5a4   :  { %v718_v19 = vpop.f32.mrb[10].mxu0 }
 0x5a5   :  { %v719_v20 = vadd.f32 %v718_v19, %v632_v13  ;;  %v1140_v21 = vpop.f32.mrb[11].mxu0  ;;  %v722_v22 = vadd.f32 %v716_v15, %v563_v57 }
 0x5a6   :  { %v1199_v21 = vld [vmem:[%s1553_s5 + $0x10] sm:$0xff]  }
 0x5a7   :  { %v724_v23 = vsel %vm297_vm2, %v722_v22, 0.0  ;;  %v723_v24 = vadd.f32 %v719_v20, %v564_v59 }
 0x5a8   :  { %725 = vadd.xlane.f32.xlu0 %v724_v23 }
 0x5a9   :  { %v727_v25 = vsel %vm297_vm2, %v723_v24, 0.0 }
 0x5aa   :  { %728 = vadd.xlane.f32.xlu1 %v727_v25 }
 0x635   :  { %v726_v26 = vpop.xlane.xlu0 %725 }
 0x636   :  { %v730_v27 = vmul.f32 0.03125, %v726_v26 }
 0x637   :  { %v729_v28 = vpop.xlane.xlu1 %728 }
 0x638   :  { %v732_v29 = vsub.f32 %v722_v22, %v730_v27  ;;  %v731_v30 = vmul.f32 0.03125, %v729_v28  ;;  %v1200_v22 = vld [vmem:[%s1553_s5 + $0x18] sm:$0xff]  }
 0x63a   :  { %v733_v31 = vsub.f32 %v723_v24, %v731_v30  ;;  %v734_v33 = vmul.f32 %v732_v29, %v732_v29 }
 0x63c   :  { %v736_v34 = vsel %vm297_vm2, %v734_v33, 0.0  ;;  %v735_v35 = vmul.f32 %v733_v31, %v733_v31 }
 0x63d   :  { %737 = vadd.xlane.f32.xlu0 %v736_v34 }
 0x63e   :  { %v739_v36 = vsel %vm297_vm2, %v735_v35, 0.0 }
 0x63f   :  { %740 = vadd.xlane.f32.xlu1 %v739_v36 }
 0x6ca   :  { %v738_v39 = vpop.xlane.xlu0 %737 }
 0x6cb   :  { %v742_v40 = vmul.f32 0.03125, %v738_v39 }
 0x6cc   :  { %v741_v41 = vpop.xlane.xlu1 %740 }
 0x6cd   :  { %v744_v44 = vadd.f32 1e-05, %v742_v40  ;;  %v743_v45 = vmul.f32 0.03125, %v741_v41 }
 0x6cf   :  { %1205 = vrsqrt.f32 %v744_v44  ;;  %v745_v46 = vadd.f32 1e-05, %v743_v45 }
 0x6d1   :  { %1207 = vrsqrt.f32 %v745_v46 }
 0x6d9   :  { %v1206_v50 = vpop.eup %1205 }
 0x6da   :  { %v748_v53 = vmul.f32 %v1206_v50, %v732_v29  ;;  %v854_v29 = vrot.slane %v1499_v52, %v442_v6 }
 0x6db   :  { %v1208_v54 = vpop.eup %1207 }
 0x6dc   :  { %v754_v56 = vmul.f32 %v753_v49, %v748_v53  ;;  %v749_v57 = vmul.f32 %v1208_v54, %v733_v31 }
 0x6de   :  { %v755_v59 = vmul.f32 %v753_v49, %v749_v57  ;;  %v760_v60 = vadd.f32 %v759_v55, %v754_v56 }
 0x6e0   :  { %v761_v61 = vadd.f32 %v759_v55, %v755_v59 }
 0x6e2   :  { %v762_v62 = vpack.c.bf16 %v761_v61, %v760_v60 }
 0x6e4   :  { %1146 = vmatmul.mubr.msk.bf16.vlgmr.msra.gmra.mrb[16].mxu1 %vm297_vm2, %v762_v62 }
 0x6e5   :  { %1153 = vmatprep.mubr.msk.bf16.mxu1 %vm1214_vm0, %v1213_v0  ;;  %1150 = vmatpush3.bf16.msra.mxu1 %v1199_v21 }
 0x6e6   :  { %1151 = vmatprep.subr.bf16.mxu1 %v1213_v0  ;;  %v860_v0 = vrot.slane %v1499_v52, %v555_v47  ;;  %v875_v47 = vrot.slane %v1499_v52, %v561_v51 }
 0x6e9   :  { %1152 = vmatpush3.bf16.msra.mxu1 %v1200_v22 }
 0x7b7   :  { %v816_v63 = vpop.f32.mrb[16].mxu1 }
 0x7b8   :  { %v817_v1 = vadd.f32 %v816_v63, %v766_v43  ;;  %v1147_v2 = vpop.f32.mrb[17].mxu1 }
 0x7b9   :  { %v819_v3 = vpop.f32.mrb[18].mxu1 }
 0x7ba   :  { %v823_v42 = vmax.f32 %v817_v1, 0.0  ;;  %v820_v4 = vadd.f32 %v819_v3, %v766_v43  ;;  %v1148_v5 = vpop.f32.mrb[19].mxu1 }
 0x7bc   :  { %v824_v7 = vmax.f32 %v820_v4, 0.0  ;;  %v825_v8 = vsel %vm297_vm2, %v823_v42, 0.0 }
 0x7bd   :  { %826 = vadd.xlane.f32.xlu0 %v825_v8 }
 0x7be   :  { %v828_v9 = vsel %vm297_vm2, %v824_v7, 0.0 }
 0x7bf   :  { %829 = vadd.xlane.f32.xlu1 %v828_v9 }
 0x84a   :  { %v827_v10 = vpop.xlane.xlu0 %826 }
 0x84b   :  { %v831_v11 = vmul.f32 0.03125, %v827_v10 }
 0x84c   :  { %v830_v12 = vpop.xlane.xlu1 %829 }
 0x84d   :  { %v833_v13 = vsub.f32 %v823_v42, %v831_v11  ;;  %v832_v14 = vmul.f32 0.03125, %v830_v12 }
 0x84f   :  { %v834_v58 = vsub.f32 %v824_v7, %v832_v14  ;;  %v835_v15 = vmul.f32 %v833_v13, %v833_v13 }
 0x851   :  { %v837_v16 = vsel %vm297_vm2, %v835_v15, 0.0  ;;  %v836_v19 = vmul.f32 %v834_v58, %v834_v58 }
 0x852   :  { %838 = vadd.xlane.f32.xlu0 %v837_v16 }
 0x853   :  { %v840_v20 = vsel %vm297_vm2, %v836_v19, 0.0 }
 0x854   :  { %841 = vadd.xlane.f32.xlu1 %v840_v20 }
 0x8df   :  { %v839_v23 = vpop.xlane.xlu0 %838 }
 0x8e0   :  { %v843_v24 = vmul.f32 0.03125, %v839_v23 }
 0x8e1   :  { %v842_v25 = vpop.xlane.xlu1 %841 }
 0x8e2   :  { %v845_v26 = vadd.f32 1e-05, %v843_v24  ;;  %v844_v27 = vmul.f32 0.03125, %v842_v25 }
 0x8e4   :  { %1209 = vrsqrt.f32 %v845_v26  ;;  %v846_v28 = vadd.f32 1e-05, %v844_v27 }
 0x8e6   :  { %1211 = vrsqrt.f32 %v846_v28 }
 0x8ee   :  { %v1210_v30 = vpop.eup %1209 }
 0x8ef   :  { %v849_v31 = vmul.f32 %v1210_v30, %v833_v13 }
 0x8f0   :  { %v1212_v33 = vpop.eup %1211 }
 0x8f1   :  { %v855_v34 = vmul.f32 %v854_v29, %v849_v31  ;;  %v850_v35 = vmul.f32 %v1212_v33, %v834_v58 }
 0x8f3   :  { %v861_v36 = vadd.f32 %v860_v0, %v855_v34  ;;  %v856_v37 = vmul.f32 %v854_v29, %v850_v35 }
 0x8f5   :  { %v862_v38 = vadd.f32 %v860_v0, %v856_v37  ;;  %v863_v39 = vadd.f32 %v861_v36, %v1335_v17 }
 0x8f7   :  { %v864_v40 = vadd.f32 %v862_v38, %v1340_v18  ;;  %865 = vst.msk [vmem:[%s1554_s7] sm:$0xff] %vm297_vm2, %v863_v39 }
 0x8f9   :  { %866 = vst.msk [vmem:[%s1554_s7 + $0x8] sm:$0xff] %vm297_vm2, %v864_v40  ;;  %v871_v6 = vpack.c.bf16 %v864_v40, %v863_v39 }
 0x8fb   :  { %1154 = vmatmul.mubr.msk.bf16.vlgmr.msra.gmra.mrb[20].mxu1 %vm297_vm2, %v871_v6 }
 0x9ce   :  { %v925_v17 = vpop.f32.mrb[20].mxu1 }
 0x9cf   :  { %v926_v41 = vadd.f32 %v925_v17, %v875_v47  ;;  %v1155_v18 = vpop.f32.mrb[21].mxu1 }
 0x9d0   :  { %v928_v44 = vpop.f32.mrb[22].mxu1 }
 0x9d1   :  { %932 = vst [vmem:[%s1555_s8] sm:$0xff] %v926_v41  ;;  %v929_v45 = vadd.f32 %v928_v44, %v875_v47  ;;  %v1156_v46 = vpop.f32.mrb[23].mxu1 }
 0x9d3   :  { %933 = vst [vmem:[%s1555_s8 + $0x8] sm:$0xff] %v929_v45 }

</bundles_post_ra>
